<compile_context>
chip_gen: v5e
topology: v5e:2x2
jax: 0.10.0
libtpu: 0.0.40
codegen_flags: <defaults>
</compile_context>

<pallas_src>
import jax
import jax.numpy as jnp
from jax.experimental import pallas as pl
from jax.experimental.pallas import tpu as pltpu


def mul_conv1x1_kernel(w_ref, x_ref, s_ref, o_ref):
    # w_ref: (Cout_blk, Cin) bf16 | x_ref: (Cin, HW) f32 | s_ref: (Cin, 1) f32
    # o_ref: (Cout_blk, HW) f32
    # Per-channel scale on the activations (VPU, lane-broadcast of the (Cin,1) column),
    # then a single MXU matmul with f32 accumulation.
    xs = (x_ref[...] * s_ref[...]).astype(w_ref.dtype)
    o_ref[...] = jnp.dot(
        w_ref[...], xs, preferred_element_type=jnp.float32
    ).astype(o_ref.dtype)


def prepare_weight(w_oihw):
    """One-time weight prep: (Cout, Cin, 1, 1) -> (Cout, Cin) in bf16.

    Pure reshape (no transpose) + a single cast; in a real model this happens once at
    parameter-load time, not per call.
    """
    Cout, Cin = w_oihw.shape[0], w_oihw.shape[1]
    return w_oihw.reshape(Cout, Cin).astype(jnp.bfloat16)


def _has_two_tensorcores():
    """Conservative detection of 2-TC-per-chip parts (v7x). Defaults to False."""
    try:
        kind = jax.devices()[0].device_kind.lower()
    except Exception:
        return False
    return "v7" in kind


def mul_conv1x1(x_nchw, s_nc11, w2d):
    """x_nchw: (N, Cin, H, W), s_nc11: (N, Cin, 1, 1), w2d: (Cout, Cin) bf16 (pre-prepared)."""
    N, Cin, H, W = x_nchw.shape
    Cout = w2d.shape[0]
    # TODO(synk): per-sample scale for N > 1 would need a batch grid axis; module spec is N == 1.
    assert N == 1, "kernel assumes batch size 1 (matches the original module)"
    HW = H * W

    x2d = x_nchw.reshape(Cin, HW)   # free reshape of NCHW (no data movement)
    s2d = s_nc11.reshape(Cin, 1)    # free reshape

    if _has_two_tensorcores() and Cout % 16 == 0:
        # v7x: shard Cout across the 2 TensorCores. Cout//2 is a multiple of 8 (sublane rule);
        # the Cin / HW block dims equal the full array dims, so (8,128) divisibility is satisfied.
        co = Cout // 2
        out2d = pl.pallas_call(
            mul_conv1x1_kernel,
            out_shape=jax.ShapeDtypeStruct((Cout, HW), x_nchw.dtype),
            grid=(2,),
            in_specs=[
                pl.BlockSpec((co, Cin), lambda i: (i, 0)),
                pl.BlockSpec((Cin, HW), lambda i: (0, 0)),
                pl.BlockSpec((Cin, 1), lambda i: (0, 0)),
            ],
            out_specs=pl.BlockSpec((co, HW), lambda i: (i, 0)),
            compiler_params=pltpu.CompilerParams(
                dimension_semantics=("parallel",)
            ),
        )(w2d, x2d, s2d)
    else:
        # v5e / v6e (1 TC): gridless whole-array call — no pipeline bookkeeping, no
        # double-buffered VMEM reservation; everything (~1.4 MB) sits in VMEM directly.
        vmem = pltpu.MemorySpace.VMEM
        out2d = pl.pallas_call(
            mul_conv1x1_kernel,
            out_shape=jax.ShapeDtypeStruct((Cout, HW), x_nchw.dtype),
            in_specs=[
                pl.BlockSpec(memory_space=vmem),
                pl.BlockSpec(memory_space=vmem),
                pl.BlockSpec(memory_space=vmem),
            ],
            out_specs=pl.BlockSpec(memory_space=vmem),
        )(w2d, x2d, s2d)

    # (Cout, HW) -> (N, Cout, H, W): free reshape, already NCHW-ordered.
    return out2d.reshape(N, Cout, H, W)


if __name__ == "__main__":
    key = jax.random.PRNGKey(0)
    k1, k2, k3 = jax.random.split(key, 3)

    N, Cin, H, W, Cout = 1, 1248, 7, 7, 208
    x311 = jax.random.normal(k1, (N, Cin, H, W), dtype=jnp.float32)
    x316 = jax.random.normal(k2, (N, Cin, 1, 1), dtype=jnp.float32)
    # Deterministic conv weight (Conv2d(1248, 208, 1, bias=False)).
    weight = jax.random.normal(k3, (Cout, Cin, 1, 1), dtype=jnp.float32) * 0.02

    w2d = prepare_weight(weight)          # done once, outside the per-call path
    out = mul_conv1x1(x311, x316, w2d)
    jax.block_until_ready(out)

    # Reference check in plain JAX (fp32). Tolerance loosened because the kernel uses a
    # bf16 weight / bf16 scaled-activation matmul with fp32 accumulation (1248-deep sum).
    ref = jnp.einsum(
        "nchw,oc->nohw", x311 * x316, weight.reshape(Cout, Cin)
    )
    assert out.shape == (N, Cout, H, W)
    assert jnp.allclose(out, ref, atol=3e-2, rtol=3e-2)

    print("KERNEL_OK")
</pallas_src>

<mosaic_0001>
module attributes {stable_mosaic.version = 11 : i64} {
  func.func @mul_conv1x1_kernel(%arg0: memref<208x1248xbf16, #tpu.memory_space<vmem>>, %arg1: memref<1248x49xf32, #tpu.memory_space<vmem>>, %arg2: memref<1248x1xf32, #tpu.memory_space<vmem>>, %arg3: memref<208x49xf32, #tpu.memory_space<vmem>>) attributes {dimension_semantics = [], scalar_prefetch = 0 : i64, scratch_operands = 0 : i64, tpu.core_type = #tpu.core_type<tc>} {
    %c0 = arith.constant 0 : index
    %c0_0 = arith.constant 0 : index
    %0 = vector.load %arg1[%c0, %c0_0] : memref<1248x49xf32, #tpu.memory_space<vmem>>, vector<1248x49xf32>
    %c0_1 = arith.constant 0 : index
    %c0_2 = arith.constant 0 : index
    %1 = vector.load %arg2[%c0_1, %c0_2] : memref<1248x1xf32, #tpu.memory_space<vmem>>, vector<1248x1xf32>
    %2 = vector.broadcast %1 : vector<1248x1xf32> to vector<1248x49xf32>
    %3 = arith.mulf %0, %2 : vector<1248x49xf32>
    %4 = arith.truncf %3 : vector<1248x49xf32> to vector<1248x49xbf16>
    %c0_3 = arith.constant 0 : index
    %c0_4 = arith.constant 0 : index
    %5 = vector.load %arg0[%c0_3, %c0_4] : memref<208x1248xbf16, #tpu.memory_space<vmem>>, vector<208x1248xbf16>
    %cst = arith.constant dense<0.000000e+00> : vector<208x49xf32>
    %6 = tpu.matmul %5, %4, %cst {dimension_numbers = #tpu.dot_dimension_numbers<[1], [0], [0], [1], [0, 0, 1, 1], [], []>} : vector<208x1248xbf16>, vector<1248x49xbf16>, vector<208x49xf32> -> vector<208x49xf32>
    %c0_5 = arith.constant 0 : index
    %c0_6 = arith.constant 0 : index
    %7 = vector.load %arg3[%c0_5, %c0_6] : memref<208x49xf32, #tpu.memory_space<vmem>>, vector<208x49xf32>
    tpu.vector_store %arg3[%c0_5, %c0_6], %6 {strides = array<i32>} : memref<208x49xf32, #tpu.memory_space<vmem>>, vector<208x49xf32>,
    return
  }
}

</mosaic_0001>

<bundles_post_ra>
// kernel: tpu_custom_call.1
= control target key start
LH: loop header
LB: loop body
LE: loop exit
PB: predicated region body
PF: predicated region fallthrough
CT: control target
= control target key end

     0   :  { %v3602_v0 = vmov 0   ;;  %vm2108_vm0 = vcmask 785408   ;;  %vm2888_vm1 = vcmask 400384   ;;  %s6054_s2 = inlined_call_operand.vmem [shape: f32[1248,1], index: 2, kind: input, shape index: {}]   ;;  %s6055_s1 = inlined_call_operand.vmem [shape: f32[1248,49], index: 1, kind: input, shape index: {}]   ;;  %s6056_s0 = inlined_call_operand.vmem [shape: bf16[208,1248], index: 0, kind: input, shape index: {}]   ;;  %s6057_s3 = inlined_call_operand.vmem [shape: f32[208,49], index: 3, kind: output, shape index: {}]  }
   0x1   :  { %3601 = vset.pattern.permute.xlu2 %v3602_v0  ;;  %3600 = vset.pattern.permute.xlu1 %v3602_v0  ;;  %v175_v1 = vld [vmem:[%s6054_s2 + $0x20] sm:$0xff]  ;;  %v173_v2 = vld [vmem:[%s6054_s2 + $0x10] sm:$0xff]  ;;  %v176_v4 = vld [vmem:[%s6054_s2 + $0x28] sm:$0xff] }
   0x2   :  { %v171_v3 = vld [vmem:[%s6054_s2] sm:$0xff]  ;;  %3599 = vset.pattern.permute.xlu0 %v3602_v0  ;;  %349 = vperm.xlu2 %3601, %v175_v1   ;;  %v174_v5 = vld [vmem:[%s6054_s2 + $0x18] sm:$0xff]  ;;  %v172_v6 = vld [vmem:[%s6054_s2 + $0x8] sm:$0xff] }
   0x3   :  { %339 = vperm.xlu1 %3600, %v173_v2   ;;  %329 = vperm.xlu0 %3599, %v171_v3   ;;  %v179_v7 = vld [vmem:[%s6054_s2 + $0x40] sm:$0xff]  ;;  %v178_v8 = vld [vmem:[%s6054_s2 + $0x38] sm:$0xff]  ;;  %v177_v9 = vld [vmem:[%s6054_s2 + $0x30] sm:$0xff] }
   0x4   :  { %v182_v10 = vld [vmem:[%s6054_s2 + $0x58] sm:$0xff]  ;;  %v181_v11 = vld [vmem:[%s6054_s2 + $0x50] sm:$0xff]  ;;  %v180_v12 = vld [vmem:[%s6054_s2 + $0x48] sm:$0xff] }
   0x5   :  { %v185_v13 = vld [vmem:[%s6054_s2 + $0x70] sm:$0xff]  ;;  %v184_v14 = vld [vmem:[%s6054_s2 + $0x68] sm:$0xff]  ;;  %v183_v15 = vld [vmem:[%s6054_s2 + $0x60] sm:$0xff] }
   0x6   :  { %v188_v16 = vld [vmem:[%s6054_s2 + $0x88] sm:$0xff]  ;;  %v187_v17 = vld [vmem:[%s6054_s2 + $0x80] sm:$0xff]  ;;  %v186_v18 = vld [vmem:[%s6054_s2 + $0x78] sm:$0xff] }
   0x7   :  { %v191_v19 = vld [vmem:[%s6054_s2 + $0xa0] sm:$0xff]  ;;  %v190_v20 = vld [vmem:[%s6054_s2 + $0x98] sm:$0xff]  ;;  %v189_v21 = vld [vmem:[%s6054_s2 + $0x90] sm:$0xff] }
   0x8   :  { %v194_v22 = vld [vmem:[%s6054_s2 + $0xb8] sm:$0xff]  ;;  %v193_v23 = vld [vmem:[%s6054_s2 + $0xb0] sm:$0xff]  ;;  %v192_v24 = vld [vmem:[%s6054_s2 + $0xa8] sm:$0xff] }
   0x9   :  { %v197_v25 = vld [vmem:[%s6054_s2 + $0xd0] sm:$0xff]  ;;  %v196_v26 = vld [vmem:[%s6054_s2 + $0xc8] sm:$0xff]  ;;  %v195_v27 = vld [vmem:[%s6054_s2 + $0xc0] sm:$0xff] }
   0xa   :  { %354 = vperm.xlu2 %3601, %v176_v4   ;;  %v200_v28 = vld [vmem:[%s6054_s2 + $0xe8] sm:$0xff]  ;;  %v199_v29 = vld [vmem:[%s6054_s2 + $0xe0] sm:$0xff]  ;;  %v198_v30 = vld [vmem:[%s6054_s2 + $0xd8] sm:$0xff] }
   0xb   :  { %344 = vperm.xlu1 %3600, %v174_v5   ;;  %334 = vperm.xlu0 %3599, %v172_v6   ;;  %v203_v31 = vld [vmem:[%s6054_s2 + $0x100] sm:$0xff]  ;;  %v202_v32 = vld [vmem:[%s6054_s2 + $0xf8] sm:$0xff]  ;;  %v201_v33 = vld [vmem:[%s6054_s2 + $0xf0] sm:$0xff] }
   0xc   :  { %v206_v34 = vld [vmem:[%s6054_s2 + $0x118] sm:$0xff]  ;;  %v205_v35 = vld [vmem:[%s6054_s2 + $0x110] sm:$0xff]  ;;  %v204_v36 = vld [vmem:[%s6054_s2 + $0x108] sm:$0xff] }
   0xd   :  { %v209_v38 = vld [vmem:[%s6054_s2 + $0x130] sm:$0xff]  ;;  %v208_v39 = vld [vmem:[%s6054_s2 + $0x128] sm:$0xff]  ;;  %v207_v40 = vld [vmem:[%s6054_s2 + $0x120] sm:$0xff] }
   0xe   :  { %v212_v42 = vld [vmem:[%s6054_s2 + $0x148] sm:$0xff]  ;;  %v211_v43 = vld [vmem:[%s6054_s2 + $0x140] sm:$0xff]  ;;  %v210_v44 = vld [vmem:[%s6054_s2 + $0x138] sm:$0xff] }
   0xf   :  { %v215_v46 = vld [vmem:[%s6054_s2 + $0x160] sm:$0xff]  ;;  %v214_v47 = vld [vmem:[%s6054_s2 + $0x158] sm:$0xff]  ;;  %v213_v48 = vld [vmem:[%s6054_s2 + $0x150] sm:$0xff] }
  0x10   :  { %v218_v52 = vld [vmem:[%s6054_s2 + $0x178] sm:$0xff]  ;;  %v217_v53 = vld [vmem:[%s6054_s2 + $0x170] sm:$0xff]  ;;  %v216_v54 = vld [vmem:[%s6054_s2 + $0x168] sm:$0xff] }
  0x11   :  { %v221_v58 = vld [vmem:[%s6054_s2 + $0x190] sm:$0xff]  ;;  %v220_v59 = vld [vmem:[%s6054_s2 + $0x188] sm:$0xff]  ;;  %v219_v60 = vld [vmem:[%s6054_s2 + $0x180] sm:$0xff] }
  0x12   :  { %369 = vperm.xlu2 %3601, %v179_v7   ;;  %v233_v0 = vld [vmem:[%s6054_s2 + $0x1f0] sm:$0xff]  ;;  %v223_v1 = vld [vmem:[%s6054_s2 + $0x1a0] sm:$0xff]  ;;  %v222_v2 = vld [vmem:[%s6054_s2 + $0x198] sm:$0xff] }
  0x13   :  { %364 = vperm.xlu1 %3600, %v178_v8   ;;  %359 = vperm.xlu0 %3599, %v177_v9   ;;  %v232_v6 = vld [vmem:[%s6054_s2 + $0x1e8] sm:$0xff]  ;;  %v231_v7 = vld [vmem:[%s6054_s2 + $0x1e0] sm:$0xff]  ;;  %v234_v8 = vld [vmem:[%s6054_s2 + $0x1f8] sm:$0xff] }
  0x1a   :  { %384 = vperm.xlu2 %3601, %v182_v10  }
  0x1b   :  { %379 = vperm.xlu1 %3600, %v181_v11   ;;  %374 = vperm.xlu0 %3599, %v180_v12   ;;  %v249_v12 = vld [vmem:[%s6054_s2 + $0x270] sm:$0xff] }
  0x22   :  { %399 = vperm.xlu2 %3601, %v185_v13   ;;  %v230_v13 = vld [vmem:[%s6054_s2 + $0x1d8] sm:$0xff] }
  0x23   :  { %394 = vperm.xlu1 %3600, %v184_v14   ;;  %389 = vperm.xlu0 %3599, %v183_v15   ;;  %v229_v14 = vld [vmem:[%s6054_s2 + $0x1d0] sm:$0xff] }
  0x24   :  { %v29_v15 = vld [vmem:[%s6055_s1 + $0x70] sm:$0xff] }
  0x2a   :  { %414 = vperm.xlu2 %3601, %v188_v16   ;;  %v32_v16 = vld [vmem:[%s6055_s1 + $0x88] sm:$0xff] }
  0x2b   :  { %409 = vperm.xlu1 %3600, %v187_v17   ;;  %404 = vperm.xlu0 %3599, %v186_v18   ;;  %v31_v17 = vld [vmem:[%s6055_s1 + $0x80] sm:$0xff]  ;;  %v30_v18 = vld [vmem:[%s6055_s1 + $0x78] sm:$0xff] }
  0x32   :  { %429 = vperm.xlu2 %3601, %v191_v19  }
  0x33   :  { %424 = vperm.xlu1 %3600, %v190_v20   ;;  %419 = vperm.xlu0 %3599, %v189_v21   ;;  %v28_v20 = vld [vmem:[%s6055_s1 + $0x68] sm:$0xff]  ;;  %v27_v21 = vld [vmem:[%s6055_s1 + $0x60] sm:$0xff] }
  0x3a   :  { %444 = vperm.xlu2 %3601, %v194_v22  }
  0x3b   :  { %439 = vperm.xlu1 %3600, %v193_v23   ;;  %434 = vperm.xlu0 %3599, %v192_v24  }
  0x42   :  { %459 = vperm.xlu2 %3601, %v197_v25  }
  0x43   :  { %454 = vperm.xlu1 %3600, %v196_v26   ;;  %449 = vperm.xlu0 %3599, %v195_v27  }
  0x4a   :  { %474 = vperm.xlu2 %3601, %v200_v28  }
  0x4b   :  { %469 = vperm.xlu1 %3600, %v199_v29   ;;  %464 = vperm.xlu0 %3599, %v198_v30  }
  0x52   :  { %489 = vperm.xlu2 %3601, %v203_v31   ;;  %v266_v31 = vld [vmem:[%s6054_s2 + $0x2f8] sm:$0xff] }
  0x53   :  { %484 = vperm.xlu1 %3600, %v202_v32   ;;  %479 = vperm.xlu0 %3599, %v201_v33   ;;  %v265_v32 = vld [vmem:[%s6054_s2 + $0x2f0] sm:$0xff] }
  0x5a   :  { %504 = vperm.xlu2 %3601, %v206_v34   ;;  %v25_v34 = vld [vmem:[%s6055_s1 + $0x50] sm:$0xff] }
  0x5b   :  { %499 = vperm.xlu1 %3600, %v205_v35   ;;  %494 = vperm.xlu0 %3599, %v204_v36   ;;  %v250_v35 = vld [vmem:[%s6054_s2 + $0x278] sm:$0xff] }
  0x5c   :  { %v3731_v37 = vpop.permute.xlu2 %349  ;;  %v26_v36 = vld [vmem:[%s6055_s1 + $0x58] sm:$0xff] }
  0x62   :  { %519 = vperm.xlu2 %3601, %v209_v38  }
  0x63   :  { %514 = vperm.xlu1 %3600, %v208_v39   ;;  %509 = vperm.xlu0 %3599, %v207_v40  }
  0x64   :  { %v3742_v41 = vpop.permute.xlu2 %354 }
  0x6a   :  { %534 = vperm.xlu2 %3601, %v212_v42   ;;  %v24_v42 = vld [vmem:[%s6055_s1 + $0x48] sm:$0xff] }
  0x6b   :  { %529 = vperm.xlu1 %3600, %v211_v43   ;;  %524 = vperm.xlu0 %3599, %v210_v44  }
  0x6c   :  { %v3753_v45 = vpop.permute.xlu2 %369 }
  0x72   :  { %549 = vperm.xlu2 %3601, %v215_v46  }
  0x73   :  { %544 = vperm.xlu1 %3600, %v214_v47   ;;  %539 = vperm.xlu0 %3599, %v213_v48   ;;  %v23_v47 = vld [vmem:[%s6055_s1 + $0x40] sm:$0xff] }
  0x74   :  { %v3764_v49 = vpop.permute.xlu2 %384 }
  0x75   :  { %v3766_v50 = vpop.permute.xlu1 %339  ;;  %v3768_v51 = vpop.permute.xlu0 %329  ;;  %v1118_v46 = vmul.f32 %v3764_v49, %v26_v36  ;;  %v22_v49 = vld [vmem:[%s6055_s1 + $0x38] sm:$0xff]  ;;  %v43_v36 = vld [vmem:[%s6055_s1 + $0xe0] sm:$0xff] }
  0x7a   :  { %564 = vperm.xlu2 %3601, %v218_v52  }
  0x7b   :  { %559 = vperm.xlu1 %3600, %v217_v53   ;;  %554 = vperm.xlu0 %3599, %v216_v54   ;;  %v247_v53 = vld [vmem:[%s6054_s2 + $0x260] sm:$0xff]  ;;  %v228_v54 = vld [vmem:[%s6054_s2 + $0x1c8] sm:$0xff] }
  0x7c   :  { %v400_v55 = vpop.permute.xlu2 %399 }
  0x7d   :  { %v3779_v56 = vpop.permute.xlu1 %344  ;;  %v3781_v57 = vpop.permute.xlu0 %334  ;;  %v1121_v24 = vmul.f32 %v400_v55, %v29_v15  ;;  %v21_v55 = vld [vmem:[%s6055_s1 + $0x30] sm:$0xff] }
  0x82   :  { %579 = vperm.xlu2 %3601, %v221_v58   ;;  %v227_v58 = vld [vmem:[%s6054_s2 + $0x1c0] sm:$0xff] }
  0x83   :  { %574 = vperm.xlu1 %3600, %v220_v59   ;;  %569 = vperm.xlu0 %3599, %v219_v60   ;;  %v1115_v59 = vmul.f32 %v3753_v45, %v23_v47  ;;  %v20_v45 = vld [vmem:[%s6055_s1 + $0x28] sm:$0xff] }
  0x84   :  { %v415_v61 = vpop.permute.xlu2 %414  ;;  %v44_v47 = vld [vmem:[%s6055_s1 + $0xe8] sm:$0xff] }
  0x85   :  { %v3792_v62 = vpop.permute.xlu1 %364  ;;  %v3794_v63 = vpop.permute.xlu0 %359  ;;  %v1124_v25 = vmul.f32 %v415_v61, %v32_v16 }
  0x86   :  { %v1114_v60 = vmul.f32 %v3792_v62, %v22_v49  ;;  %v1113_v61 = vmul.f32 %v3794_v63, %v21_v55  ;;  %v1112_v63 = vmul.f32 %v3742_v41, %v20_v45  ;;  %v42_v49 = vld [vmem:[%s6055_s1 + $0xd8] sm:$0xff]  ;;  %v224_v55 = vld [vmem:[%s6054_s2 + $0x1a8] sm:$0xff] }
  0x87   :  { %v40_v45 = vld [vmem:[%s6055_s1 + $0xc8] sm:$0xff] }
  0x8a   :  { %639 = vperm.xlu2 %3601, %v233_v0  }
  0x8b   :  { %589 = vperm.xlu1 %3600, %v223_v1   ;;  %584 = vperm.xlu0 %3599, %v222_v2   ;;  %v19_v2 = vld [vmem:[%s6055_s1 + $0x20] sm:$0xff] }
  0x8c   :  { %v3805_v3 = vpop.permute.xlu2 %429  ;;  %v1111_v62 = vmul.f32 %v3731_v37, %v19_v2  ;;  %v17_v37 = vld [vmem:[%s6055_s1 + $0x10] sm:$0xff] }
  0x8d   :  { %v380_v4 = vpop.permute.xlu1 %379  ;;  %v375_v5 = vpop.permute.xlu0 %374 }
  0x8e   :  { %v1117_v38 = vmul.f32 %v380_v4, %v25_v34  ;;  %v1116_v48 = vmul.f32 %v375_v5, %v24_v42  ;;  %v45_v34 = vld [vmem:[%s6055_s1 + $0xf0] sm:$0xff] }
  0x90   :  { %v1268_v52 = vpack.c.bf16 %v1118_v46, %v1117_v38  ;;  %v1267_v1 = vpack.c.bf16 %v1116_v48, %v1115_v59  ;;  %v3241_v59 = vld [vmem:[%s6056_s0 + $0x280] sm:$0xf] }
  0x92   :  { %634 = vperm.xlu2 %3601, %v232_v6   ;;  %v1266_v6 = vpack.c.bf16 %v1114_v60, %v1113_v61  ;;  %v3537_v60 = vld [vmem:[%s6056_s0 + $0x2a4] sm:$0xf0]  ;;  %v41_v61 = vld [vmem:[%s6055_s1 + $0xd0] sm:$0xff] }
  0x93   :  { %629 = vperm.xlu1 %3600, %v231_v7   ;;  %644 = vperm.xlu0 %3599, %v234_v8   ;;  %v264_v7 = vld [vmem:[%s6054_s2 + $0x2e8] sm:$0xff]  ;;  %v263_v8 = vld [vmem:[%s6054_s2 + $0x2e0] sm:$0xff] }
  0x94   :  { %v3816_v9 = vpop.permute.xlu2 %444 }
  0x95   :  { %v395_v10 = vpop.permute.xlu1 %394  ;;  %v390_v11 = vpop.permute.xlu0 %389 }
  0x96   :  { %v1120_v28 = vmul.f32 %v395_v10, %v28_v20  ;;  %v1119_v29 = vmul.f32 %v390_v11, %v27_v21  ;;  %v18_v10 = vld [vmem:[%s6055_s1 + $0x18] sm:$0xff]  ;;  %v248_v11 = vld [vmem:[%s6054_s2 + $0x268] sm:$0xff]  ;;  %v245_v21 = vld [vmem:[%s6054_s2 + $0x250] sm:$0xff] }
  0x97   :  { %v1110_v41 = vmul.f32 %v3779_v56, %v18_v10  ;;  %v15_v56 = vld [vmem:[%s6055_s1] sm:$0xff] }
  0x98   :  { %v1269_v40 = vpack.c.bf16 %v1120_v28, %v1119_v29 }
  0x9a   :  { %719 = vperm.xlu2 %3601, %v249_v12  }
  0x9b   :  { %624 = vperm.xlu1 %3600, %v230_v13   ;;  %619 = vperm.xlu0 %3599, %v229_v14   ;;  %v1265_v13 = vpack.c.bf16 %v1112_v63, %v1111_v62  ;;  %v16_v14 = vld [vmem:[%s6055_s1 + $0x8] sm:$0xff]  ;;  %v39_v62 = vld [vmem:[%s6055_s1 + $0xc0] sm:$0xff] }
  0x9c   :  { %v3839_v19 = vpop.permute.xlu2 %459 }
  0x9d   :  { %v410_v22 = vpop.permute.xlu1 %409  ;;  %v405_v23 = vpop.permute.xlu0 %404 }
  0x9e   :  { %v1123_v26 = vmul.f32 %v410_v22, %v31_v17  ;;  %v1122_v27 = vmul.f32 %v405_v23, %v30_v18  ;;  %v1109_v17 = vmul.f32 %v3766_v50, %v17_v37  ;;  %v1108_v18 = vmul.f32 %v3781_v57, %v16_v14  ;;  %v226_v22 = vld [vmem:[%s6054_s2 + $0x1b8] sm:$0xff]  ;;  %v225_v50 = vld [vmem:[%s6054_s2 + $0x1b0] sm:$0xff] }
  0x9f   :  { %v1107_v23 = vmul.f32 %v3768_v51, %v15_v56  ;;  %v3201_v57 = vld [vmem:[%s6056_s0 + $0x230] sm:$0xf]  ;;  %v262_v51 = vld [vmem:[%s6054_s2 + $0x2d8] sm:$0xff] }
  0xa0   :  { %v1270_v30 = vpack.c.bf16 %v1122_v27, %v1121_v24  ;;  %v3853_v33 = vpack.c.bf16 %v1124_v25, %v1123_v26  ;;  %v1264_v20 = vpack.c.bf16 %v1110_v41, %v1109_v17  ;;  %v3527_v24 = vld [vmem:[%s6056_s0 + $0x254] sm:$0xf0]  ;;  %v241_v41 = vld [vmem:[%s6054_s2 + $0x230] sm:$0xff] }
  0xa1   :  { %v1263_v26 = vpack.c.bf16 %v1108_v18, %v1107_v23  ;;  %v3202_v29 = vor.u32 %v3527_v24, %v3201_v57  ;;  %v37_v14 = vld [vmem:[%s6055_s1 + $0xb0] sm:$0xff]  ;;  %v36_v18 = vld [vmem:[%s6055_s1 + $0xa8] sm:$0xff]  ;;  %v258_v57 = vld [vmem:[%s6054_s2 + $0x2b8] sm:$0xff] }
  0xa2   :  { %2148 = vmatpush.bf16.msra.mxu0 %v1270_v30  ;;  %3582 = vmatpush.bf16.msra.mxu2 %v1270_v30  ;;  %v261_v30 = vld [vmem:[%s6054_s2 + $0x2d0] sm:$0xff] }
  0xa3   :  { %804 = vperm.xlu2 %3601, %v266_v31   ;;  %799 = vperm.xlu1 %3600, %v265_v32   ;;  %v246_v31 = vld [vmem:[%s6054_s2 + $0x258] sm:$0xff]  ;;  %v257_v24 = vld [vmem:[%s6054_s2 + $0x2b0] sm:$0xff] }
  0xa4   :  { %724 = vperm.xlu0 %3599, %v250_v35   ;;  %v3864_v39 = vpop.permute.xlu2 %474  ;;  %v46_v32 = vld [vmem:[%s6055_s1 + $0xf8] sm:$0xff] }
  0xa5   :  { %v3869_v43 = vpop.permute.xlu1 %424  ;;  %v3871_v44 = vpop.permute.xlu0 %419 }
  0xa6   :  { %2149 = vmatpush.bf16.msra.mxu0 %v1269_v40  ;;  %3583 = vmatpush.bf16.msra.mxu2 %v1269_v40 }
  0xaa   :  { %2150 = vmatpush.bf16.msra.mxu0 %v1268_v52  ;;  %3584 = vmatpush.bf16.msra.mxu2 %v1268_v52 }
  0xab   :  { %709 = vperm.xlu2 %3601, %v247_v53   ;;  %614 = vperm.xlu1 %3600, %v228_v54   ;;  %v244_v53 = vld [vmem:[%s6054_s2 + $0x248] sm:$0xff]  ;;  %v243_v54 = vld [vmem:[%s6054_s2 + $0x240] sm:$0xff] }
  0xac   :  { %609 = vperm.xlu0 %3599, %v227_v58   ;;  %v3895_v0 = vpop.permute.xlu2 %489  ;;  %v1136_v58 = vmul.f32 %v3864_v39, %v44_v47  ;;  %v239_v47 = vld [vmem:[%s6054_s2 + $0x220] sm:$0xff] }
  0xad   :  { %v3903_v4 = vpop.permute.xlu1 %439  ;;  %v3905_v5 = vpop.permute.xlu0 %434 }
  0xae   :  { %2151 = vmatpush.bf16.msra.mxu0 %v1267_v1  ;;  %3585 = vmatpush.bf16.msra.mxu2 %v1267_v1 }
  0xb2   :  { %2152 = vmatpush.bf16.msra.mxu0 %v1266_v6  ;;  %3586 = vmatpush.bf16.msra.mxu2 %v1266_v6 }
  0xb3   :  { %794 = vperm.xlu2 %3601, %v264_v7   ;;  %789 = vperm.xlu1 %3600, %v263_v8   ;;  %v3242_v7 = vor.u32 %v3537_v60, %v3241_v59  ;;  %v1133_v8 = vmul.f32 %v3839_v19, %v41_v61  ;;  %v259_v19 = vld [vmem:[%s6054_s2 + $0x2c0] sm:$0xff]  ;;  %v238_v61 = vld [vmem:[%s6054_s2 + $0x218] sm:$0xff] }
  0xb4   :  { %714 = vperm.xlu0 %3599, %v248_v11   ;;  %v3925_v12 = vpop.permute.xlu2 %504 }
  0xb5   :  { %v3930_v15 = vpop.permute.xlu1 %454  ;;  %v3932_v16 = vpop.permute.xlu0 %449 }
  0xb6   :  { %2153 = vmatpush.bf16.msra.mxu0 %v1265_v13  ;;  %3587 = vmatpush.bf16.msra.mxu2 %v1265_v13  ;;  %v1132_v10 = vmul.f32 %v3930_v15, %v40_v45  ;;  %v1131_v11 = vmul.f32 %v3932_v16, %v39_v62  ;;  %v260_v13 = vld [vmem:[%s6054_s2 + $0x2c8] sm:$0xff]  ;;  %v38_v15 = vld [vmem:[%s6055_s1 + $0xb8] sm:$0xff]  ;;  %v1129_v16 = vmul.f32 %v3903_v4, %v37_v14  ;;  %v35_v4 = vld [vmem:[%s6055_s1 + $0xa0] sm:$0xff] }
  0xb7   :  { %v3321_v45 = vld [vmem:[%s6056_s0 + $0x320] sm:$0xf]  ;;  %v62_v62 = vld [vmem:[%s6055_s1 + $0x178] sm:$0xff] }
  0xb8   :  { %v1275_v56 = vpack.c.bf16 %v1132_v10, %v1131_v11  ;;  %v2961_v10 = vld [vmem:[%s6056_s0 + $0x50] sm:$0xf]  ;;  %v3467_v14 = vld [vmem:[%s6056_s0 + $0x74] sm:$0xf0] }
  0xba   :  { %2154 = vmatpush.bf16.msra.mxu0 %v1264_v20  ;;  %3588 = vmatpush.bf16.msra.mxu2 %v1264_v20 }
  0xbb   :  { %699 = vperm.xlu2 %3601, %v245_v21   ;;  %604 = vperm.xlu1 %3600, %v226_v22   ;;  %v1130_v22 = vmul.f32 %v3816_v9, %v38_v15  ;;  %v34_v9 = vld [vmem:[%s6055_s1 + $0x98] sm:$0xff] }
  0xbc   :  { %599 = vperm.xlu0 %3599, %v225_v50   ;;  %v3955_v25 = vpop.permute.xlu2 %519  ;;  %v1128_v50 = vmul.f32 %v3905_v5, %v36_v18  ;;  %v242_v5 = vld [vmem:[%s6054_s2 + $0x238] sm:$0xff] }
  0xbd   :  { %v470_v27 = vpop.permute.xlu1 %469  ;;  %v465_v28 = vpop.permute.xlu0 %464  ;;  %v1274_v23 = vpack.c.bf16 %v1130_v22, %v1129_v16  ;;  %v2962_v16 = vor.u32 %v3467_v14, %v2961_v10  ;;  %v58_v18 = vld [vmem:[%s6055_s1 + $0x158] sm:$0xff]  ;;  %v51_v10 = vld [vmem:[%s6055_s1 + $0x120] sm:$0xff] }
  0xbe   :  { %2155 = vmatpush.bf16.msra.mxu0 %v1263_v26  ;;  %3589 = vmatpush.bf16.msra.mxu2 %v1263_v26  ;;  %v1135_v48 = vmul.f32 %v470_v27, %v43_v36  ;;  %v1134_v1 = vmul.f32 %v465_v28, %v42_v49  ;;  %v33_v26 = vld [vmem:[%s6055_s1 + $0x90] sm:$0xff]  ;;  %v1127_v27 = vmul.f32 %v3805_v3, %v35_v4 }
  0xbf   :  { %v3281_v28 = vld [vmem:[%s6056_s0 + $0x2d0] sm:$0xf] }
  0xc0   :  { %v1277_v39 = vpack.c.bf16 %v1136_v58, %v1135_v48  ;;  %v1276_v37 = vpack.c.bf16 %v1134_v1, %v1133_v8  ;;  %v1273_v3 = vpack.c.bf16 %v1128_v50, %v1127_v27  ;;  %v3522_v48 = vld [vmem:[%s6056_s0 + $0x234] sm:$0xf]  ;;  %v235_v50 = vld [vmem:[%s6054_s2 + $0x200] sm:$0xff]  ;;  %v2963_v27 = vld [vmem:[%s6056_s0 + $0x78] sm:$0xf0] }
  0xc1   :  { %2191 = vmatmul.bf16.vlgmr.msra.gmra.mxu2 %v3202_v29  ;;  %v3547_v29 = vld [vmem:[%s6056_s0 + $0x2f4] sm:$0xf0]  ;;  %v237_v1 = vld [vmem:[%s6054_s2 + $0x210] sm:$0xff] }
  0xc3   :  { %784 = vperm.xlu2 %3601, %v262_v51   ;;  %779 = vperm.xlu1 %3600, %v261_v30   ;;  %v1126_v51 = vmul.f32 %v3869_v43, %v34_v9  ;;  %v1125_v30 = vmul.f32 %v3871_v44, %v33_v26  ;;  %v3243_v26 = vld [vmem:[%s6056_s0 + $0x2a8] sm:$0xf0] }
  0xc4   :  { %704 = vperm.xlu0 %3599, %v246_v31   ;;  %v3972_v35 = vpop.permute.xlu2 %534 }
  0xc5   :  { %v485_v38 = vpop.permute.xlu1 %484  ;;  %v480_v40 = vpop.permute.xlu0 %479  ;;  %v1272_v44 = vpack.c.bf16 %v1126_v51, %v1125_v30 }
  0xc6   :  { %v1138_v42 = vmul.f32 %v485_v38, %v46_v32  ;;  %v1137_v46 = vmul.f32 %v480_v40, %v45_v34  ;;  %v2921_v32 = vld [vmem:[%s6056_s0] sm:$0xf]  ;;  %v3457_v34 = vld [vmem:[%s6056_s0 + $0x24] sm:$0xf0]  ;;  %v3282_v40 = vor.u32 %v3547_v29, %v3281_v28 }
  0xc7   :  { %v2922_v43 = vor.u32 %v3457_v34, %v2921_v32  ;;  %v64_v28 = vld [vmem:[%s6055_s1 + $0x188] sm:$0xff]  ;;  %v55_v32 = vld [vmem:[%s6055_s1 + $0x140] sm:$0xff] }
  0xc8   :  { %v1278_v52 = vpack.c.bf16 %v1138_v42, %v1137_v46  ;;  %v255_v42 = vld [vmem:[%s6054_s2 + $0x2a0] sm:$0xff]  ;;  %v240_v46 = vld [vmem:[%s6054_s2 + $0x228] sm:$0xff] }
  0xc9   :  { %2156 = vmatmul.bf16.vlgmr.msra.gmra.mxu0 %v2922_v43 }
  0xca   :  { %2222 = vmatpush.bf16.msra.mxu1 %v1278_v52  ;;  %3590 = vmatpush.bf16.msra.mxu3 %v1278_v52  ;;  %v3203_v52 = vld [vmem:[%s6056_s0 + $0x258] sm:$0xf0] }
  0xcb   :  { %694 = vperm.xlu2 %3601, %v244_v53   ;;  %689 = vperm.xlu1 %3600, %v243_v54   ;;  %v3452_v53 = vld [vmem:[%s6056_s0 + $0x4] sm:$0xf]  ;;  %v2923_v54 = vld [vmem:[%s6056_s0 + $0x28] sm:$0xf0]  ;;  %v3206_v59 = vor.u32 %v3522_v48, %v3203_v52 }
  0xcc   :  { %594 = vperm.xlu0 %3599, %v224_v55   ;;  %v4002_v2 = vpop.permute.xlu2 %549  ;;  %v2926_v60 = vor.u32 %v3452_v53, %v2923_v54  ;;  %v252_v53 = vld [vmem:[%s6054_s2 + $0x288] sm:$0xff]  ;;  %v251_v54 = vld [vmem:[%s6054_s2 + $0x280] sm:$0xff] }
  0xcd   :  { %v4010_v63 = vpop.permute.xlu1 %499  ;;  %v4012_v6 = vpop.permute.xlu0 %494 }
  0xce   :  { %2223 = vmatpush.bf16.msra.mxu1 %v1277_v39  ;;  %3591 = vmatpush.bf16.msra.mxu3 %v1277_v39  ;;  %v256_v39 = vld [vmem:[%s6054_s2 + $0x2a8] sm:$0xff] }
  0xd1   :  { %2196 = vmatmul.bf16.gmra.mxu2 %v3242_v7  ;;  %v61_v7 = vld [vmem:[%s6055_s1 + $0x170] sm:$0xff] }
  0xd2   :  { %2224 = vmatpush.bf16.msra.mxu1 %v1276_v37  ;;  %3592 = vmatpush.bf16.msra.mxu3 %v1276_v37 }
  0xd3   :  { %679 = vperm.xlu2 %3601, %v241_v41   ;;  %774 = vperm.xlu1 %3600, %v260_v13   ;;  %v60_v41 = vld [vmem:[%s6055_s1 + $0x168] sm:$0xff] }
  0xd4   :  { %769 = vperm.xlu0 %3599, %v259_v19   ;;  %v4033_v17 = vpop.permute.xlu2 %564 }
  0xd5   :  { %v4038_v20 = vpop.permute.xlu1 %514  ;;  %v4040_v21 = vpop.permute.xlu0 %509  ;;  %v1154_v19 = vmul.f32 %v4033_v17, %v62_v62  ;;  %v254_v17 = vld [vmem:[%s6054_s2 + $0x298] sm:$0xff]  ;;  %v3001_v62 = vld [vmem:[%s6056_s0 + $0xa0] sm:$0xf] }
  0xd6   :  { %2225 = vmatpush.bf16.msra.mxu1 %v1275_v56  ;;  %3593 = vmatpush.bf16.msra.mxu3 %v1275_v56  ;;  %v59_v56 = vld [vmem:[%s6055_s1 + $0x160] sm:$0xff] }
  0xd7   :  { %v1151_v9 = vmul.f32 %v4002_v2, %v59_v56  ;;  %v63_v2 = vld [vmem:[%s6055_s1 + $0x180] sm:$0xff] }
  0xd9   :  { %2161 = vmatmul.bf16.gmra.mxu0 %v2962_v16 }
  0xda   :  { %2226 = vmatpush.bf16.msra.mxu1 %v1274_v23  ;;  %3594 = vmatpush.bf16.msra.mxu3 %v1274_v23  ;;  %v57_v23 = vld [vmem:[%s6055_s1 + $0x150] sm:$0xff] }
  0xdb   :  { %764 = vperm.xlu2 %3601, %v258_v57   ;;  %759 = vperm.xlu1 %3600, %v257_v24   ;;  %v253_v57 = vld [vmem:[%s6054_s2 + $0x290] sm:$0xff]  ;;  %v3532_v24 = vld [vmem:[%s6056_s0 + $0x284] sm:$0xf] }
  0xdc   :  { %684 = vperm.xlu0 %3599, %v242_v5   ;;  %v4071_v31 = vpop.permute.xlu2 %579  ;;  %v3462_v5 = vld [vmem:[%s6056_s0 + $0x54] sm:$0xf]  ;;  %v3246_v43 = vor.u32 %v3532_v24, %v3243_v26  ;;  %v50_v24 = vld [vmem:[%s6055_s1 + $0x118] sm:$0xff] }
  0xdd   :  { %v4079_v36 = vpop.permute.xlu1 %529  ;;  %v4081_v38 = vpop.permute.xlu0 %524  ;;  %v77_v26 = vld [vmem:[%s6055_s1 + $0x1f0] sm:$0xff] }
  0xde   :  { %2227 = vmatpush.bf16.msra.mxu1 %v1273_v3  ;;  %3595 = vmatpush.bf16.msra.mxu3 %v1273_v3  ;;  %v1147_v48 = vmul.f32 %v4079_v36, %v55_v32  ;;  %v236_v36 = vld [vmem:[%s6054_s2 + $0x208] sm:$0xff]  ;;  %v75_v32 = vld [vmem:[%s6055_s1 + $0x1e0] sm:$0xff] }
  0xe1   :  { %2201 = vmatmul.bf16.gmra.mxu2 %v3282_v40 }
  0xe2   :  { %2228 = vmatpush.bf16.msra.mxu1 %v1272_v44  ;;  %3596 = vmatpush.bf16.msra.mxu3 %v1272_v44  ;;  %v2966_v44 = vor.u32 %v3462_v5, %v2963_v27  ;;  %v78_v5 = vld [vmem:[%s6055_s1 + $0x1f8] sm:$0xff] }
  0xe3   :  { %749 = vperm.xlu2 %3601, %v255_v42   ;;  %674 = vperm.xlu1 %3600, %v240_v46  }
  0xe4   :  { %669 = vperm.xlu0 %3599, %v239_v47   ;;  %v4104_v49 = vpop.permute.xlu2 %639  ;;  %v56_v47 = vld [vmem:[%s6055_s1 + $0x148] sm:$0xff] }
  0xe5   :  { %v545_v55 = vpop.permute.xlu1 %544  ;;  %v540_v58 = vpop.permute.xlu0 %539 }
  0xe6   :  { %2229 = vmatpush.bf16.msra.mxu1 %v3853_v33  ;;  %3597 = vmatpush.bf16.msra.mxu3 %v3853_v33  ;;  %v3557_v33 = vld [vmem:[%s6056_s0 + $0x344] sm:$0xf0]  ;;  %v1150_v29 = vmul.f32 %v545_v55, %v58_v18  ;;  %v1149_v51 = vmul.f32 %v540_v58, %v57_v23  ;;  %v54_v58 = vld [vmem:[%s6055_s1 + $0x138] sm:$0xff]  ;;  %v1143_v18 = vmul.f32 %v4040_v21, %v51_v10  ;;  %v3542_v21 = vld [vmem:[%s6056_s0 + $0x2d4] sm:$0xf] }
  0xe7   :  { %v3322_v13 = vor.u32 %v3557_v33, %v3321_v45  ;;  %v66_v45 = vld [vmem:[%s6055_s1 + $0x198] sm:$0xff]  ;;  %v3472_v23 = vld [vmem:[%s6056_s0 + $0xa4] sm:$0xf] }
  0xe8   :  { %v1284_v52 = vpack.c.bf16 %v1150_v29, %v1149_v51 }
  0xe9   :  { %2265 = vmatmul.bf16.vlgmr.msra.gmra.mxu3 %v3206_v59  ;;  %2230 = vmatmul.bf16.vlgmr.msra.gmra.mxu1 %v2926_v60  ;;  %v1148_v59 = vmul.f32 %v3972_v35, %v56_v47  ;;  %v3361_v60 = vld [vmem:[%s6056_s0 + $0x370] sm:$0xf]  ;;  %v1146_v35 = vmul.f32 %v4081_v38, %v54_v58  ;;  %v279_v58 = vld [vmem:[%s6054_s2 + $0x360] sm:$0xff] }
  0xeb   :  { %664 = vperm.xlu2 %3601, %v238_v61   ;;  %659 = vperm.xlu1 %3600, %v237_v1   ;;  %v3567_v61 = vld [vmem:[%s6056_s0 + $0x394] sm:$0xf0]  ;;  %v53_v1 = vld [vmem:[%s6055_s1 + $0x130] sm:$0xff]  ;;  %v1283_v33 = vpack.c.bf16 %v1148_v59, %v1147_v48  ;;  %v76_v48 = vld [vmem:[%s6055_s1 + $0x1e8] sm:$0xff] }
  0xec   :  { %754 = vperm.xlu0 %3599, %v256_v39   ;;  %v4129_v8 = vpop.permute.xlu2 %634  ;;  %v65_v39 = vld [vmem:[%s6055_s1 + $0x190] sm:$0xff]  ;;  %v3577_v59 = vld [vmem:[%s6056_s0 + $0x3e4] sm:$0xf0] }
  0xed   :  { %v560_v11 = vpop.permute.xlu1 %559  ;;  %v555_v37 = vpop.permute.xlu0 %554 }
  0xee   :  { %v1153_v15 = vmul.f32 %v560_v11, %v61_v7  ;;  %v1152_v22 = vmul.f32 %v555_v37, %v60_v41  ;;  %v52_v7 = vld [vmem:[%s6055_s1 + $0x128] sm:$0xff]  ;;  %v3362_v37 = vor.u32 %v3567_v61, %v3361_v60  ;;  %v1168_v60 = vmul.f32 %v4129_v8, %v76_v48  ;;  %v74_v61 = vld [vmem:[%s6055_s1 + $0x1d8] sm:$0xff] }
  0xef   :  { %v3477_v41 = vld [vmem:[%s6056_s0 + $0xc4] sm:$0xf0]  ;;  %v1144_v56 = vmul.f32 %v4038_v20, %v52_v7  ;;  %v281_v20 = vld [vmem:[%s6054_s2 + $0x370] sm:$0xff] }
  0xf0   :  { %v1286_v4 = vpack.c.bf16 %v1154_v19, %v1153_v15  ;;  %v1285_v3 = vpack.c.bf16 %v1152_v22, %v1151_v9  ;;  %v3002_v19 = vor.u32 %v3477_v41, %v3001_v62  ;;  %v4240_v15 = vmul.f32 %v4071_v31, %v65_v39  ;;  %v49_v31 = vld [vmem:[%s6055_s1 + $0x110] sm:$0xff]  ;;  %v3487_v62 = vld [vmem:[%s6056_s0 + $0x114] sm:$0xf0] }
  0xf1   :  { %2206 = vmatmul.bf16.gmra.mxu2 %v3322_v13  ;;  %v1145_v13 = vmul.f32 %v3955_v25, %v53_v1  ;;  %v282_v25 = vld [vmem:[%s6054_s2 + $0x378] sm:$0xff]  ;;  %v1141_v9 = vmul.f32 %v4010_v63, %v49_v31  ;;  %v1281_v27 = vpack.c.bf16 %v1144_v56, %v1143_v18  ;;  %v1142_v63 = vmul.f32 %v3925_v12, %v50_v24  ;;  %v3041_v39 = vld [vmem:[%s6056_s0 + $0xf0] sm:$0xf]  ;;  %v295_v56 = vld [vmem:[%s6054_s2 + $0x3e0] sm:$0xff] }
  0xf2   :  { %2296 = vmatpush.bf16.msrb.mxu2 %v1286_v4  ;;  %v297_v4 = vld [vmem:[%s6054_s2 + $0x3f0] sm:$0xff]  ;;  %2166 = vmatmul.bf16.gmra.mxu0 %v3002_v19  ;;  %v296_v19 = vld [vmem:[%s6054_s2 + $0x3e8] sm:$0xff]  ;;  %v3552_v18 = vld [vmem:[%s6056_s0 + $0x324] sm:$0xf] }
  0xf3   :  { %649 = vperm.xlu2 %3601, %v235_v50   ;;  %744 = vperm.xlu1 %3600, %v254_v17   ;;  %v1282_v22 = vpack.c.bf16 %v1146_v35, %v1145_v13  ;;  %v3283_v17 = vld [vmem:[%s6056_s0 + $0x2f8] sm:$0xf0]  ;;  %v1280_v12 = vpack.c.bf16 %v1142_v63, %v1141_v9  ;;  %v277_v13 = vld [vmem:[%s6054_s2 + $0x350] sm:$0xff] }
  0xf4   :  { %739 = vperm.xlu0 %3599, %v253_v57   ;;  %v4178_v30 = vpop.permute.xlu2 %719  ;;  %v3003_v57 = vld [vmem:[%s6056_s0 + $0xc8] sm:$0xf0]  ;;  %v3286_v51 = vor.u32 %v3542_v21, %v3283_v17  ;;  %v110_v31 = vld [vmem:[%s6055_s1 + $0x2f8] sm:$0xff]  ;;  %v93_v21 = vld [vmem:[%s6055_s1 + $0x270] sm:$0xff] }
  0xf5   :  { %v575_v34 = vpop.permute.xlu1 %574  ;;  %v570_v40 = vpop.permute.xlu0 %569  ;;  %v94_v17 = vld [vmem:[%s6055_s1 + $0x278] sm:$0xff] }
  0xf6   :  { %v4183_v42 = vmul.f32 %v575_v34, %v64_v28  ;;  %v4185_v46 = vmul.f32 %v570_v40, %v63_v2  ;;  %2297 = vmatpush.bf16.msrb.mxu2 %v1285_v3  ;;  %v48_v28 = vld [vmem:[%s6055_s1 + $0x108] sm:$0xff]  ;;  %v3006_v3 = vor.u32 %v3472_v23, %v3003_v57  ;;  %v47_v40 = vld [vmem:[%s6055_s1 + $0x100] sm:$0xff] }
  0xf7   :  { %v1140_v47 = vmul.f32 %v4012_v6, %v48_v28  ;;  %v1139_v6 = vmul.f32 %v3895_v0, %v47_v40  ;;  %v73_v0 = vld [vmem:[%s6055_s1 + $0x1d0] sm:$0xff]  ;;  %v1185_v28 = vmul.f32 %v4178_v30, %v93_v21  ;;  %v2929_v30 = vld [vmem:[%s6056_s0 + $0x8] sm:$0xf]  ;;  %v70_v21 = vld [vmem:[%s6055_s1 + $0x1b8] sm:$0xff] }
  0xf8   :  { %v1287_v55 = vpack.c.bf16 %v4183_v42, %v4185_v46  ;;  %v72_v40 = vld [vmem:[%s6055_s1 + $0x1c8] sm:$0xff] }
  0xf9   :  { %2270 = vmatmul.bf16.gmra.mxu3 %v3246_v43  ;;  %2235 = vmatmul.bf16.gmra.mxu1 %v2966_v44  ;;  %v1169_v43 = vmul.f32 %v4104_v49, %v77_v26  ;;  %v298_v49 = vld [vmem:[%s6054_s2 + $0x3f8] sm:$0xff]  ;;  %v1279_v1 = vpack.c.bf16 %v1140_v47, %v1139_v6  ;;  %v275_v6 = vld [vmem:[%s6054_s2 + $0x340] sm:$0xff] }
  0xfa   :  { %2298 = vmatpush.bf16.msrb.mxu2 %v1284_v52  ;;  %v280_v52 = vld [vmem:[%s6054_s2 + $0x368] sm:$0xff] }
  0xfb   :  { %734 = vperm.xlu2 %3601, %v252_v53   ;;  %729 = vperm.xlu1 %3600, %v251_v54  }
  0xfc   :  { %654 = vperm.xlu0 %3599, %v236_v36   ;;  %v3401_v36 = vld [vmem:[%s6056_s0 + $0x3c0] sm:$0xf] }
  0xfd   :  { %v4231_v11 = vpop.permute.xlu2 %804  ;;  %v4233_v38 = vpop.permute.xlu1 %589 }
  0xfe   :  { %v585_v14 = vpop.permute.xlu0 %584  ;;  %2299 = vmatpush.bf16.msrb.mxu2 %v1283_v33  ;;  %v3402_v33 = vor.u32 %v3577_v59, %v3401_v36  ;;  %v1202_v26 = vmul.f32 %v4231_v11, %v110_v31  ;;  %v3458_v11 = vld [vmem:[%s6056_s0 + $0x2c] sm:$0xf0]  ;;  %v314_v59 = vld [vmem:[%s6054_s2 + $0x478] sm:$0xff]  ;;  %v291_v31 = vld [vmem:[%s6054_s2 + $0x3c0] sm:$0xff] }
  0xff   :  { %v4242_v16 = vmul.f32 %v585_v14, %v66_v45 }
 0x101   :  { %2211 = vmatmul.bf16.gmra.mxu2 %v3362_v37  ;;  %v1288_v50 = vpack.c.bf16 %v4242_v16, %v4240_v15  ;;  %v3042_v37 = vor.u32 %v3487_v62, %v3041_v39  ;;  %v3083_v39 = vld [vmem:[%s6056_s0 + $0x168] sm:$0xf0] }
 0x102   :  { %2300 = vmatpush.bf16.msrb.mxu2 %v1282_v22  ;;  %v3323_v22 = vld [vmem:[%s6056_s0 + $0x348] sm:$0xf0] }
 0x103   :  { %959 = vperm.xlu2 %3601, %v297_v4   ;;  %884 = vperm.xlu1 %3600, %v282_v25   ;;  %v3482_v4 = vld [vmem:[%s6056_s0 + $0xf4] sm:$0xf]  ;;  %v3043_v25 = vld [vmem:[%s6056_s0 + $0x118] sm:$0xf0]  ;;  %v3326_v24 = vor.u32 %v3552_v18, %v3323_v22  ;;  %v92_v62 = vld [vmem:[%s6055_s1 + $0x268] sm:$0xff] }
 0x104   :  { %879 = vperm.xlu0 %3599, %v281_v20   ;;  %2171 = vmatmul.bf16.gmra.mxu0 %v3042_v37  ;;  %v109_v20 = vld [vmem:[%s6055_s1 + $0x2f0] sm:$0xff]  ;;  %v3046_v9 = vor.u32 %v3482_v4, %v3043_v25  ;;  %v292_v4 = vld [vmem:[%s6054_s2 + $0x3c8] sm:$0xff] }
 0x105   :  { %v4285_v2 = vpop.permute.xlu2 %709  ;;  %v630_v29 = vpop.permute.xlu1 %629  ;;  %v272_v15 = vld [vmem:[%s6054_s2 + $0x328] sm:$0xff] }
 0x106   :  { %v645_v34 = vpop.permute.xlu0 %644  ;;  %2301 = vmatpush.bf16.msrb.mxu2 %v1281_v27  ;;  %v1167_v53 = vmul.f32 %v630_v29, %v75_v32  ;;  %v293_v32 = vld [vmem:[%s6054_s2 + $0x3d0] sm:$0xff] }
 0x107   :  { %v1170_v44 = vmul.f32 %v645_v34, %v78_v5  ;;  %v278_v34 = vld [vmem:[%s6054_s2 + $0x358] sm:$0xff] }
 0x108   :  { %v1293_v45 = vpack.c.bf16 %v1168_v60, %v1167_v53  ;;  %v313_v60 = vld [vmem:[%s6054_s2 + $0x470] sm:$0xff] }
 0x109   :  { %v1294_v54 = vpack.c.bf16 %v1170_v44, %v1169_v43  ;;  %2275 = vmatmul.bf16.gmra.mxu3 %v3286_v51  ;;  %2240 = vmatmul.bf16.gmra.mxu1 %v3006_v3  ;;  %v294_v3 = vld [vmem:[%s6054_s2 + $0x3d8] sm:$0xff]  ;;  %v71_v43 = vld [vmem:[%s6055_s1 + $0x1c0] sm:$0xff] }
 0x10a   :  { %2302 = vmatpush.bf16.msrb.mxu2 %v1280_v12  ;;  %v3081_v44 = vld [vmem:[%s6056_s0 + $0x140] sm:$0xf]  ;;  %v2930_v12 = vor.u32 %v3458_v11, %v2929_v30  ;;  %v3572_v30 = vld [vmem:[%s6056_s0 + $0x3c4] sm:$0xf]  ;;  %v3403_v11 = vld [vmem:[%s6056_s0 + $0x3e8] sm:$0xf0] }
 0x10b   :  { %2370 = vmatpush.bf16.msrb.mxu3 %v1294_v54  ;;  %874 = vperm.xlu2 %3601, %v280_v52   ;;  %v3497_v52 = vld [vmem:[%s6056_s0 + $0x164] sm:$0xf0] }
 0x10c   :  { %869 = vperm.xlu1 %3600, %v279_v58   ;;  %964 = vperm.xlu0 %3599, %v298_v49   ;;  %v3082_v58 = vor.u32 %v3497_v52, %v3081_v44  ;;  %v106_v44 = vld [vmem:[%s6055_s1 + $0x2d8] sm:$0xff] }
 0x10d   :  { %v4325_v35 = vpop.permute.xlu2 %794  ;;  %v625_v8 = vpop.permute.xlu1 %624  ;;  %v90_v52 = vld [vmem:[%s6055_s1 + $0x258] sm:$0xff] }
 0x10e   :  { %v1166_v7 = vmul.f32 %v625_v8, %v74_v61  ;;  %v620_v10 = vpop.permute.xlu0 %619  ;;  %2303 = vmatpush.bf16.msrb.mxu2 %v1279_v1  ;;  %v3562_v61 = vld [vmem:[%s6056_s0 + $0x374] sm:$0xf]  ;;  %v3492_v1 = vld [vmem:[%s6056_s0 + $0x144] sm:$0xf]  ;;  %v108_v8 = vld [vmem:[%s6055_s1 + $0x2e8] sm:$0xff] }
 0x10f   :  { %v1165_v41 = vmul.f32 %v620_v10, %v73_v0  ;;  %2371 = vmatpush.bf16.msrb.mxu3 %v1293_v45  ;;  %v3363_v0 = vld [vmem:[%s6056_s0 + $0x398] sm:$0xf0]  ;;  %v107_v45 = vld [vmem:[%s6055_s1 + $0x2e0] sm:$0xff] }
 0x110   :  { %v3366_v37 = vor.u32 %v3562_v61, %v3363_v0 }
 0x111   :  { %2216 = vmatmul.bf16.gmra.mxu2 %v3402_v33  ;;  %v1292_v14 = vpack.c.bf16 %v1166_v7, %v1165_v41  ;;  %v91_v33 = vld [vmem:[%s6055_s1 + $0x260] sm:$0xff]  ;;  %v3086_v41 = vor.u32 %v3492_v1, %v3083_v39  ;;  %v290_v1 = vld [vmem:[%s6054_s2 + $0x3b8] sm:$0xff] }
 0x113   :  { %2372 = vmatpush.bf16.msrb.mxu3 %v1292_v14  ;;  %859 = vperm.xlu2 %3601, %v277_v13   ;;  %v1200_v13 = vmul.f32 %v4325_v35, %v108_v8  ;;  %v3468_v35 = vld [vmem:[%s6056_s0 + $0x7c] sm:$0xf0]  ;;  %v289_v8 = vld [vmem:[%s6054_s2 + $0x3b0] sm:$0xff] }
 0x114   :  { %954 = vperm.xlu1 %3600, %v296_v19   ;;  %949 = vperm.xlu0 %3599, %v295_v56   ;;  %v1183_v56 = vmul.f32 %v4285_v2, %v91_v33  ;;  %v2969_v2 = vld [vmem:[%s6056_s0 + $0x58] sm:$0xf]  ;;  %v88_v33 = vld [vmem:[%s6055_s1 + $0x248] sm:$0xff] }
 0x115   :  { %v4363_v23 = vpop.permute.xlu2 %699  ;;  %v800_v57 = vpop.permute.xlu1 %799  ;;  %2176 = vmatmul.bf16.gmra.mxu0 %v3082_v58  ;;  %v3406_v58 = vor.u32 %v3572_v30, %v3403_v11  ;;  %v326_v11 = vld [vmem:[%s6054_s2 + $0x4d8] sm:$0xff] }
 0x116   :  { %v1201_v5 = vmul.f32 %v800_v57, %v109_v20  ;;  %v725_v27 = vpop.permute.xlu0 %724  ;;  %v276_v20 = vld [vmem:[%s6054_s2 + $0x348] sm:$0xff]  ;;  %v3121_v57 = vld [vmem:[%s6056_s0 + $0x190] sm:$0xf] }
 0x117   :  { %v1186_v29 = vmul.f32 %v725_v27, %v94_v17  ;;  %v69_v17 = vld [vmem:[%s6055_s1 + $0x1b0] sm:$0xff] }
 0x118   :  { %v1310_v51 = vpack.c.bf16 %v1202_v26, %v1201_v5  ;;  %v2970_v26 = vor.u32 %v3468_v35, %v2969_v2  ;;  %v3507_v5 = vld [vmem:[%s6056_s0 + $0x1b4] sm:$0xf0]  ;;  %v271_v35 = vld [vmem:[%s6054_s2 + $0x320] sm:$0xff] }
 0x119   :  { %v1302_v63 = vpack.c.bf16 %v1186_v29, %v1185_v28  ;;  %2280 = vmatmul.bf16.gmra.mxu3 %v3326_v24  ;;  %2245 = vmatmul.bf16.gmra.mxu1 %v3046_v9  ;;  %v3122_v29 = vor.u32 %v3507_v5, %v3121_v57  ;;  %v3163_v57 = vld [vmem:[%s6056_s0 + $0x208] sm:$0xf0]  ;;  %v103_v5 = vld [vmem:[%s6055_s1 + $0x2c0] sm:$0xff] }
 0x11a   :  { %2518 = vmatpush.bf16.msrb.mxu1 %v1310_v51 }
 0x11b   :  { %2444 = vmatpush.bf16.msrb.mxu0 %v1302_v63  ;;  %944 = vperm.xlu2 %3601, %v294_v3   ;;  %v273_v3 = vld [vmem:[%s6054_s2 + $0x330] sm:$0xff] }
 0x11c   :  { %939 = vperm.xlu1 %3600, %v293_v32   ;;  %864 = vperm.xlu0 %3599, %v278_v34   ;;  %v312_v32 = vld [vmem:[%s6054_s2 + $0x468] sm:$0xff]  ;;  %v311_v34 = vld [vmem:[%s6054_s2 + $0x460] sm:$0xff] }
 0x11d   :  { %v4391_v47 = vpop.permute.xlu2 %784  ;;  %v615_v48 = vpop.permute.xlu1 %614 }
 0x11e   :  { %v1164_v53 = vmul.f32 %v615_v48, %v72_v40  ;;  %v610_v54 = vpop.permute.xlu0 %609  ;;  %v3502_v40 = vld [vmem:[%s6056_s0 + $0x194] sm:$0xf] }
 0x11f   :  { %v1163_v49 = vmul.f32 %v610_v54, %v71_v43  ;;  %v3123_v43 = vld [vmem:[%s6056_s0 + $0x1b8] sm:$0xf0]  ;;  %v105_v48 = vld [vmem:[%s6055_s1 + $0x2d0] sm:$0xff] }
 0x121   :  { %2304 = vmatmul.bf16.vlgmr.msrb.gmra.mxu2 %v2930_v12  ;;  %v1291_v36 = vpack.c.bf16 %v1164_v53, %v1163_v49  ;;  %v89_v12 = vld [vmem:[%s6055_s1 + $0x250] sm:$0xff]  ;;  %v3126_v49 = vor.u32 %v3502_v40, %v3123_v43  ;;  %v3488_v43 = vld [vmem:[%s6056_s0 + $0x11c] sm:$0xf0] }
 0x122   :  { %v325_v40 = vld [vmem:[%s6054_s2 + $0x4d0] sm:$0xff] }
 0x123   :  { %2373 = vmatpush.bf16.msrb.mxu3 %v1291_v36  ;;  %849 = vperm.xlu2 %3601, %v275_v6   ;;  %v1198_v6 = vmul.f32 %v4391_v47, %v106_v44  ;;  %v3478_v47 = vld [vmem:[%s6056_s0 + $0xcc] sm:$0xf0]  ;;  %v102_v44 = vld [vmem:[%s6055_s1 + $0x2b8] sm:$0xff] }
 0x124   :  { %1044 = vperm.xlu1 %3600, %v314_v59   ;;  %1039 = vperm.xlu0 %3599, %v313_v60   ;;  %v1181_v60 = vmul.f32 %v4363_v23, %v89_v12  ;;  %v3009_v23 = vld [vmem:[%s6056_s0 + $0xa8] sm:$0xf]  ;;  %v85_v12 = vld [vmem:[%s6055_s1 + $0x230] sm:$0xff] }
 0x125   :  { %v4429_v7 = vpop.permute.xlu2 %694  ;;  %v790_v10 = vpop.permute.xlu1 %789  ;;  %2181 = vmatmul.bf16.gmra.mxu0 %v3122_v29 }
 0x126   :  { %v1199_v14 = vmul.f32 %v790_v10, %v107_v45  ;;  %v715_v19 = vpop.permute.xlu0 %714  ;;  %v274_v45 = vld [vmem:[%s6054_s2 + $0x338] sm:$0xff]  ;;  %v67_v10 = vld [vmem:[%s6055_s1 + $0x1a0] sm:$0xff] }
 0x127   :  { %v1184_v18 = vmul.f32 %v715_v19, %v92_v62  ;;  %v87_v62 = vld [vmem:[%s6055_s1 + $0x240] sm:$0xff] }
 0x128   :  { %v1309_v22 = vpack.c.bf16 %v1200_v13, %v1199_v14  ;;  %v3010_v14 = vor.u32 %v3478_v47, %v3009_v23  ;;  %v3161_v19 = vld [vmem:[%s6056_s0 + $0x1e0] sm:$0xf] }
 0x129   :  { %v1301_v25 = vpack.c.bf16 %v1184_v18, %v1183_v56  ;;  %2285 = vmatmul.bf16.gmra.mxu3 %v3366_v37  ;;  %2250 = vmatmul.bf16.gmra.mxu1 %v3086_v41  ;;  %v68_v37 = vld [vmem:[%s6055_s1 + $0x1a8] sm:$0xff]  ;;  %v1180_v56 = vmul.f32 %v4429_v7, %v88_v33  ;;  %v310_v7 = vld [vmem:[%s6054_s2 + $0x458] sm:$0xff] }
 0x12a   :  { %2519 = vmatpush.bf16.msrb.mxu1 %v1309_v22 }
 0x12b   :  { %2445 = vmatpush.bf16.msrb.mxu0 %v1301_v25  ;;  %934 = vperm.xlu2 %3601, %v292_v4   ;;  %v3517_v4 = vld [vmem:[%s6056_s0 + $0x204] sm:$0xf0]  ;;  %v1159_v25 = vmul.f32 %v4233_v38, %v67_v10  ;;  %v3512_v38 = vld [vmem:[%s6056_s0 + $0x1e4] sm:$0xf]  ;;  %v3463_v10 = vld [vmem:[%s6056_s0 + $0x5c] sm:$0xf] }
 0x12c   :  { %929 = vperm.xlu1 %3600, %v291_v31   ;;  %854 = vperm.xlu0 %3599, %v276_v20   ;;  %v3162_v20 = vor.u32 %v3517_v4, %v3161_v19  ;;  %v3166_v29 = vor.u32 %v3512_v38, %v3163_v57  ;;  %v269_v19 = vld [vmem:[%s6054_s2 + $0x310] sm:$0xff] }
 0x12d   :  { %v4457_v24 = vpop.permute.xlu2 %679  ;;  %v605_v9 = vpop.permute.xlu1 %604  ;;  %v3498_v4 = vld [vmem:[%s6056_s0 + $0x16c] sm:$0xf0] }
 0x12e   :  { %v1162_v27 = vmul.f32 %v605_v9, %v70_v21  ;;  %v600_v28 = vpop.permute.xlu0 %599  ;;  %v104_v9 = vld [vmem:[%s6055_s1 + $0x2c8] sm:$0xff] }
 0x12f   :  { %v1161_v51 = vmul.f32 %v600_v28, %v69_v17  ;;  %v309_v17 = vld [vmem:[%s6054_s2 + $0x450] sm:$0xff] }
 0x131   :  { %2309 = vmatmul.bf16.gmra.mxu2 %v2970_v26  ;;  %v1290_v63 = vpack.c.bf16 %v1162_v27, %v1161_v51 }
 0x133   :  { %2374 = vmatpush.bf16.msrb.mxu3 %v1290_v63  ;;  %839 = vperm.xlu2 %3601, %v273_v3  }
 0x134   :  { %1034 = vperm.xlu1 %3600, %v312_v32   ;;  %1029 = vperm.xlu0 %3599, %v311_v34   ;;  %v3453_v32 = vld [vmem:[%s6056_s0 + $0xc] sm:$0xf]  ;;  %v2931_v34 = vld [vmem:[%s6056_s0 + $0x30] sm:$0xf0] }
 0x135   :  { %v4495_v53 = vpop.permute.xlu2 %764  ;;  %v780_v54 = vpop.permute.xlu1 %779  ;;  %2186 = vmatmul.bf16.gmra.mxu0 %v3162_v20  ;;  %v2934_v16 = vor.u32 %v3453_v32, %v2931_v34  ;;  %v99_v20 = vld [vmem:[%s6055_s1 + $0x2a0] sm:$0xff]  ;;  %v324_v32 = vld [vmem:[%s6054_s2 + $0x4c8] sm:$0xff] }
 0x136   :  { %v1197_v36 = vmul.f32 %v780_v54, %v105_v48  ;;  %v705_v59 = vpop.permute.xlu0 %704  ;;  %v101_v48 = vld [vmem:[%s6055_s1 + $0x2b0] sm:$0xff]  ;;  %v86_v54 = vld [vmem:[%s6055_s1 + $0x238] sm:$0xff] }
 0x137   :  { %v1182_v61 = vmul.f32 %v705_v59, %v90_v52 }
 0x138   :  { %v1308_v0 = vpack.c.bf16 %v1198_v6, %v1197_v36  ;;  %v1177_v36 = vmul.f32 %v4457_v24, %v85_v12  ;;  %v84_v24 = vld [vmem:[%s6055_s1 + $0x228] sm:$0xff]  ;;  %v3011_v12 = vld [vmem:[%s6056_s0 + $0xd0] sm:$0xf0] }
 0x139   :  { %v1300_v39 = vpack.c.bf16 %v1182_v61, %v1181_v60  ;;  %2290 = vmatmul.bf16.gmra.mxu3 %v3406_v58  ;;  %2255 = vmatmul.bf16.gmra.mxu1 %v3126_v49  ;;  %v1194_v58 = vmul.f32 %v4495_v53, %v102_v44  ;;  %v287_v53 = vld [vmem:[%s6054_s2 + $0x3a0] sm:$0xff] }
 0x13a   :  { %2520 = vmatpush.bf16.msrb.mxu1 %v1308_v0  ;;  %v307_v0 = vld [vmem:[%s6054_s2 + $0x440] sm:$0xff] }
 0x13b   :  { %2446 = vmatpush.bf16.msrb.mxu0 %v1300_v39  ;;  %924 = vperm.xlu2 %3601, %v290_v1   ;;  %v288_v1 = vld [vmem:[%s6054_s2 + $0x3a8] sm:$0xff] }
 0x13c   :  { %919 = vperm.xlu1 %3600, %v289_v8   ;;  %844 = vperm.xlu0 %3599, %v274_v45   ;;  %v83_v8 = vld [vmem:[%s6055_s1 + $0x220] sm:$0xff] }
 0x13d   :  { %v4526_v41 = vpop.permute.xlu2 %749  ;;  %v690_v13 = vpop.permute.xlu1 %689 }
 0x13e   :  { %v1179_v18 = vmul.f32 %v690_v13, %v87_v62  ;;  %v595_v22 = vpop.permute.xlu0 %594 }
 0x13f   :  { %v1160_v31 = vmul.f32 %v595_v22, %v68_v37  ;;  %v2971_v37 = vld [vmem:[%s6056_s0 + $0x80] sm:$0xf0]  ;;  %v3089_v22 = vld [vmem:[%s6056_s0 + $0x148] sm:$0xf] }
 0x140   :  { %v1299_v2 = vpack.c.bf16 %v1180_v56, %v1179_v18  ;;  %v308_v56 = vld [vmem:[%s6054_s2 + $0x448] sm:$0xff]  ;;  %v2974_v18 = vor.u32 %v3463_v10, %v2971_v37  ;;  %v3090_v38 = vor.u32 %v3498_v4, %v3089_v22 }
 0x141   :  { %2314 = vmatmul.bf16.gmra.mxu2 %v3010_v14  ;;  %v1289_v21 = vpack.c.bf16 %v1160_v31, %v1159_v25  ;;  %v270_v14 = vld [vmem:[%s6054_s2 + $0x318] sm:$0xff]  ;;  %v81_v31 = vld [vmem:[%s6055_s1 + $0x210] sm:$0xff] }
 0x142   :  { %2447 = vmatpush.bf16.msrb.mxu0 %v1299_v2  ;;  %v82_v25 = vld [vmem:[%s6055_s1 + $0x218] sm:$0xff] }
 0x143   :  { %2375 = vmatpush.bf16.msrb.mxu3 %v1289_v21  ;;  %829 = vperm.xlu2 %3601, %v271_v35   ;;  %v100_v35 = vld [vmem:[%s6055_s1 + $0x2a8] sm:$0xff] }
 0x144   :  { %1024 = vperm.xlu1 %3600, %v310_v7   ;;  %1019 = vperm.xlu0 %3599, %v309_v17   ;;  %v4554_v26 = vpop.f32.mrf.mxu2 }
 0x145   :  { %v4559_v27 = vpop.permute.xlu2 %664  ;;  %v775_v28 = vpop.permute.xlu1 %774 }
 0x146   :  { %v1196_v51 = vmul.f32 %v775_v28, %v104_v9  ;;  %v770_v3 = vpop.permute.xlu0 %769  ;;  %v2157_v21 = vpop.f32.mrf.mxu0  ;;  %v1174_v57 = vmul.f32 %v4559_v27, %v82_v25  ;;  %v1191_v28 = vmul.f32 %v4526_v41, %v99_v20  ;;  %v323_v27 = vld [vmem:[%s6054_s2 + $0x4c0] sm:$0xff]  ;;  %v98_v41 = vld [vmem:[%s6055_s1 + $0x298] sm:$0xff] }
 0x147   :  { %v1195_v63 = vmul.f32 %v770_v3, %v103_v5  ;;  %2376 = vmatpush.bf16.msrb.mxu3 %v1288_v50  ;;  %v3049_v50 = vld [vmem:[%s6056_s0 + $0xf8] sm:$0xf] }
 0x149   :  { %v1307_v30 = vpack.c.bf16 %v1196_v51, %v1195_v63  ;;  %2260 = vmatmul.bf16.gmra.mxu1 %v3166_v29  ;;  %v285_v63 = vld [vmem:[%s6054_s2 + $0x390] sm:$0xff] }
 0x14b   :  { %2377 = vmatpush.bf16.msrb.mxu3 %v1287_v55  ;;  %2521 = vmatpush.bf16.msrb.mxu1 %v1307_v30  ;;  %v3050_v55 = vor.u32 %v3488_v43, %v3049_v50  ;;  %v97_v30 = vld [vmem:[%s6055_s1 + $0x290] sm:$0xff] }
 0x14c   :  { %1104 = vperm.xlu2 %3601, %v326_v11   ;;  %1099 = vperm.xlu1 %3600, %v325_v40   ;;  %v4597_v52 = vpop.f32.mrf.mxu2 }
 0x14d   :  { %834 = vperm.xlu0 %3599, %v272_v15   ;;  %v4602_v42 = vpop.permute.xlu2 %649  ;;  %v760_v46 = vpop.permute.xlu1 %759 }
 0x14e   :  { %v1193_v49 = vmul.f32 %v760_v46, %v101_v48  ;;  %v685_v6 = vpop.permute.xlu0 %684  ;;  %2378 = vmatmul.bf16.vlgmr.msrb.gmra.mxu3 %v2934_v16  ;;  %v4681_v11 = vpop.f32.mrf.mxu0  ;;  %v3473_v48 = vld [vmem:[%s6056_s0 + $0xac] sm:$0xf] }
 0x14f   :  { %v1178_v59 = vmul.f32 %v685_v6, %v86_v54  ;;  %v3014_v6 = vor.u32 %v3473_v48, %v3011_v12  ;;  %v3169_v48 = vld [vmem:[%s6056_s0 + $0x1e8] sm:$0xf]  ;;  %v3518_v12 = vld [vmem:[%s6056_s0 + $0x20c] sm:$0xf0] }
 0x150   :  { %v1306_v60 = vpack.c.bf16 %v1194_v58, %v1193_v49  ;;  %v305_v58 = vld [vmem:[%s6054_s2 + $0x430] sm:$0xff]  ;;  %v286_v49 = vld [vmem:[%s6054_s2 + $0x398] sm:$0xff] }
 0x151   :  { %2319 = vmatmul.bf16.gmra.mxu2 %v3050_v55  ;;  %v1298_v61 = vpack.c.bf16 %v1178_v59, %v1177_v36  ;;  %v306_v55 = vld [vmem:[%s6054_s2 + $0x438] sm:$0xff]  ;;  %v3508_v59 = vld [vmem:[%s6056_s0 + $0x1bc] sm:$0xf0] }
 0x152   :  { %2522 = vmatpush.bf16.msrb.mxu1 %v1306_v60  ;;  %v3129_v36 = vld [vmem:[%s6056_s0 + $0x198] sm:$0xf]  ;;  %v96_v60 = vld [vmem:[%s6055_s1 + $0x288] sm:$0xff] }
 0x153   :  { %2448 = vmatpush.bf16.msrb.mxu0 %v1298_v61  ;;  %v95_v61 = vld [vmem:[%s6055_s1 + $0x280] sm:$0xff] }
 0x154   :  { %1009 = vperm.xlu2 %3601, %v307_v0   ;;  %914 = vperm.xlu1 %3600, %v288_v1   ;;  %v4618_v39 = vpop.f32.mrf.mxu2  ;;  %v79_v0 = vld [vmem:[%s6055_s1 + $0x200] sm:$0xff] }
 0x155   :  { %909 = vperm.xlu0 %3599, %v287_v53   ;;  %v4623_v45 = vpop.permute.xlu2 %734  ;;  %v675_v23 = vpop.permute.xlu1 %674  ;;  %v80_v53 = vld [vmem:[%s6055_s1 + $0x208] sm:$0xff] }
 0x156   :  { %v1176_v47 = vmul.f32 %v675_v23, %v84_v24  ;;  %v670_v33 = vpop.permute.xlu0 %669  ;;  %v2162_v22 = vpop.f32.mrf.mxu0 }
 0x157   :  { %v1175_v62 = vmul.f32 %v670_v33, %v83_v8  ;;  %v3130_v33 = vor.u32 %v3508_v59, %v3129_v36 }
 0x159   :  { %v1297_v13 = vpack.c.bf16 %v1176_v47, %v1175_v62  ;;  %v1188_v62 = vmul.f32 %v4623_v45, %v96_v60  ;;  %v2937_v45 = vld [vmem:[%s6056_s0 + $0x10] sm:$0xf] }
 0x15b   :  { %2449 = vmatpush.bf16.msrb.mxu0 %v1297_v13  ;;  %v3454_v13 = vld [vmem:[%s6056_s0 + $0x14] sm:$0xf] }
 0x15c   :  { %824 = vperm.xlu2 %3601, %v270_v14   ;;  %819 = vperm.xlu1 %3600, %v269_v19   ;;  %v4655_v2 = vpop.f32.mrf.mxu2  ;;  %v2939_v14 = vld [vmem:[%s6056_s0 + $0x38] sm:$0xf0] }
 0x15d   :  { %1014 = vperm.xlu0 %3599, %v308_v56   ;;  %v4660_v7 = vpop.permute.xlu2 %959  ;;  %v660_v17 = vpop.permute.xlu1 %659  ;;  %v1171_v56 = vmul.f32 %v4602_v42, %v79_v0  ;;  %v268_v42 = vld [vmem:[%s6054_s2 + $0x308] sm:$0xff]  ;;  %v2942_v20 = vor.u32 %v3454_v13, %v2939_v14 }
 0x15e   :  { %v1173_v9 = vmul.f32 %v660_v17, %v81_v31  ;;  %v755_v5 = vpop.permute.xlu0 %754  ;;  %2383 = vmatmul.bf16.gmra.mxu3 %v2974_v18  ;;  %v3459_v18 = vld [vmem:[%s6056_s0 + $0x34] sm:$0xf0]  ;;  %v321_v31 = vld [vmem:[%s6054_s2 + $0x4b0] sm:$0xff]  ;;  %v3469_v13 = vld [vmem:[%s6056_s0 + $0x84] sm:$0xf0] }
 0x15f   :  { %v1192_v29 = vmul.f32 %v755_v5, %v100_v35  ;;  %v267_v35 = vld [vmem:[%s6054_s2 + $0x300] sm:$0xff]  ;;  %v126_v17 = vld [vmem:[%s6055_s1 + $0x378] sm:$0xff] }
 0x160   :  { %v1296_v51 = vpack.c.bf16 %v1174_v57, %v1173_v9  ;;  %v125_v57 = vld [vmem:[%s6055_s1 + $0x370] sm:$0xff] }
 0x161   :  { %2324 = vmatmul.bf16.gmra.mxu2 %v3090_v38  ;;  %v1305_v3 = vpack.c.bf16 %v1192_v29, %v1191_v28 }
 0x162   :  { %2450 = vmatpush.bf16.msrb.mxu0 %v1296_v51 }
 0x163   :  { %2523 = vmatpush.bf16.msrb.mxu1 %v1305_v3 }
 0x164   :  { %899 = vperm.xlu2 %3601, %v285_v63   ;;  %1094 = vperm.xlu1 %3600, %v324_v32   ;;  %v4676_v34 = vpop.f32.mrf.mxu2 }
 0x165   :  { %1089 = vperm.xlu0 %3599, %v323_v27   ;;  %v4683_v40 = vpop.permute.xlu2 %874  ;;  %v745_v15 = vpop.permute.xlu1 %744  ;;  %v3483_v27 = vld [vmem:[%s6056_s0 + $0xfc] sm:$0xf] }
 0x166   :  { %v1190_v16 = vmul.f32 %v745_v15, %v98_v41  ;;  %v740_v50 = vpop.permute.xlu0 %739  ;;  %v2231_v43 = vpop.f32.mrf.mxu1  ;;  %v3051_v41 = vld [vmem:[%s6056_s0 + $0x120] sm:$0xf0] }
 0x167   :  { %v1189_v44 = vmul.f32 %v740_v50, %v97_v30  ;;  %v4691_v54 = vadd.f32 %v2231_v43, %v2157_v21  ;;  %v2938_v21 = vor.u32 %v3459_v18, %v2937_v45  ;;  %v4773_v15 = vpop.f32.mrf.mxu0  ;;  %v283_v50 = vld [vmem:[%s6054_s2 + $0x380] sm:$0xff]  ;;  %v322_v43 = vld [vmem:[%s6054_s2 + $0x4b8] sm:$0xff] }
 0x169   :  { %v1304_v46 = vpack.c.bf16 %v1190_v16, %v1189_v44  ;;  %v3054_v44 = vor.u32 %v3483_v27, %v3051_v41  ;;  %v302_v41 = vld [vmem:[%s6054_s2 + $0x418] sm:$0xff] }
 0x16b   :  { %2524 = vmatpush.bf16.msrb.mxu1 %v1304_v46  ;;  %v141_v46 = vld [vmem:[%s6055_s1 + $0x3f0] sm:$0xff] }
 0x16c   :  { %1004 = vperm.xlu2 %3601, %v306_v55   ;;  %999 = vperm.xlu1 %3600, %v305_v58   ;;  %v4717_v1 = vpop.f32.mrf.mxu2  ;;  %v2266_v24 = vpop.f32.mrf.mxu3  ;;  %v124_v55 = vld [vmem:[%s6055_s1 + $0x368] sm:$0xff] }
 0x16d   :  { %904 = vperm.xlu0 %3599, %v286_v49   ;;  %v4722_v8 = vpop.permute.xlu2 %859  ;;  %v730_v23 = vpop.permute.xlu1 %729  ;;  %v4725_v47 = vadd.f32 %v2266_v24, %v4554_v26  ;;  %v123_v49 = vld [vmem:[%s6055_s1 + $0x360] sm:$0xff] }
 0x16e   :  { %v1187_v10 = vmul.f32 %v730_v23, %v95_v61  ;;  %v655_v37 = vpop.permute.xlu0 %654  ;;  %2388 = vmatmul.bf16.gmra.mxu3 %v3014_v6  ;;  %v4734_v19 = vpop.f32.mrf.mxu1  ;;  %v142_v6 = vld [vmem:[%s6055_s1 + $0x3f8] sm:$0xff]  ;;  %v3170_v61 = vor.u32 %v3518_v12, %v3169_v48  ;;  %v3464_v24 = vld [vmem:[%s6056_s0 + $0x64] sm:$0xf]  ;;  %v2979_v23 = vld [vmem:[%s6056_s0 + $0x88] sm:$0xf0] }
 0x16f   :  { %v1172_v26 = vmul.f32 %v655_v37, %v80_v53  ;;  %v2982_v18 = vor.u32 %v3464_v24, %v2979_v23  ;;  %v121_v48 = vld [vmem:[%s6055_s1 + $0x350] sm:$0xff]  ;;  %v138_v12 = vld [vmem:[%s6055_s1 + $0x3d8] sm:$0xff] }
 0x170   :  { %v1303_v4 = vpack.c.bf16 %v1188_v62, %v1187_v10  ;;  %v1216_v62 = vmul.f32 %v4683_v40, %v124_v55  ;;  %v304_v40 = vld [vmem:[%s6054_s2 + $0x428] sm:$0xff]  ;;  %v137_v55 = vld [vmem:[%s6055_s1 + $0x3d0] sm:$0xff] }
 0x171   :  { %2329 = vmatmul.bf16.gmra.mxu2 %v3130_v33  ;;  %v1295_v25 = vpack.c.bf16 %v1172_v26, %v1171_v56  ;;  %v1233_v33 = vmul.f32 %v4660_v7, %v141_v46  ;;  %v2167_v56 = vpop.f32.mrf.mxu0  ;;  %v319_v7 = vld [vmem:[%s6054_s2 + $0x4a0] sm:$0xff]  ;;  %v3474_v23 = vld [vmem:[%s6056_s0 + $0xb4] sm:$0xf] }
 0x172   :  { %2525 = vmatpush.bf16.msrb.mxu1 %v1303_v4 }
 0x173   :  { %2451 = vmatpush.bf16.msrb.mxu0 %v1295_v25 }
 0x174   :  { %1079 = vperm.xlu2 %3601, %v321_v31   ;;  %814 = vperm.xlu1 %3600, %v268_v42   ;;  %v4755_v38 = vpop.f32.mrf.mxu2  ;;  %v2268_v9 = vpop.f32.mrf.mxu3  ;;  %v140_v31 = vld [vmem:[%s6055_s1 + $0x3e8] sm:$0xff]  ;;  %v139_v42 = vld [vmem:[%s6055_s1 + $0x3e0] sm:$0xff] }
 0x175   :  { %809 = vperm.xlu0 %3599, %v267_v35   ;;  %v4760_v5 = vpop.permute.xlu2 %944  ;;  %v885_v28 = vpop.permute.xlu1 %884  ;;  %2526 = vmatmul.bf16.vlgmr.msrb.gmra.mxu1 %v2942_v20  ;;  %v4763_v29 = vadd.f32 %v2268_v9, %v4597_v52  ;;  %v284_v52 = vld [vmem:[%s6054_s2 + $0x388] sm:$0xff] }
 0x176   :  { %v1218_v51 = vmul.f32 %v885_v28, %v126_v17  ;;  %v880_v3 = vpop.permute.xlu0 %879  ;;  %2452 = vmatmul.bf16.vlgmr.msrb.gmra.mxu0 %v2938_v21  ;;  %v2236_v63 = vpop.f32.mrf.mxu1 }
 0x177   :  { %v1217_v32 = vmul.f32 %v880_v3, %v125_v57  ;;  %v4771_v30 = vadd.f32 %v2236_v63, %v2162_v22  ;;  %v303_v22 = vld [vmem:[%s6054_s2 + $0x420] sm:$0xff]  ;;  %v3091_v3 = vld [vmem:[%s6056_s0 + $0x170] sm:$0xf0] }
 0x179   :  { %v1318_v16 = vpack.c.bf16 %v1218_v51, %v1217_v32  ;;  %v3493_v51 = vld [vmem:[%s6056_s0 + $0x14c] sm:$0xf]  ;;  %v4853_v32 = vpop.f32.mrf.mxu0 }
 0x17b   :  { %2592 = vmatpush.bf16.msra.mxu2 %v1318_v16  ;;  %v301_v16 = vld [vmem:[%s6054_s2 + $0x410] sm:$0xff] }
 0x17c   :  { %894 = vperm.xlu2 %3601, %v284_v52   ;;  %889 = vperm.xlu1 %3600, %v283_v50   ;;  %v4796_v58 = vpop.f32.mrf.mxu2  ;;  %v2271_v36 = vpop.f32.mrf.mxu3  ;;  %v320_v52 = vld [vmem:[%s6054_s2 + $0x4a8] sm:$0xff]  ;;  %v3094_v50 = vor.u32 %v3493_v51, %v3091_v3 }
 0x17d   :  { %1084 = vperm.xlu0 %3599, %v322_v43   ;;  %v4804_v59 = vpop.permute.xlu2 %849  ;;  %v4807_v60 = vadd.f32 %v2271_v36, %v4618_v39  ;;  %v2977_v39 = vld [vmem:[%s6056_s0 + $0x60] sm:$0xf]  ;;  %v3209_v43 = vld [vmem:[%s6056_s0 + $0x238] sm:$0xf] }
 0x17e   :  { %v870_v0 = vpop.permute.xlu1 %869  ;;  %v965_v53 = vpop.permute.xlu0 %964  ;;  %2393 = vmatmul.bf16.gmra.mxu3 %v3054_v44  ;;  %v2978_v4 = vor.u32 %v3469_v13, %v2977_v39  ;;  %v3528_v44 = vld [vmem:[%s6056_s0 + $0x25c] sm:$0xf0]  ;;  %v3479_v13 = vld [vmem:[%s6056_s0 + $0xd4] sm:$0xf0] }
 0x17f   :  { %v1215_v10 = vmul.f32 %v870_v0, %v123_v49  ;;  %v1234_v37 = vmul.f32 %v965_v53, %v142_v6  ;;  %v4823_v14 = vpop.f32.mrf.mxu1  ;;  %v122_v49 = vld [vmem:[%s6055_s1 + $0x358] sm:$0xff]  ;;  %v3210_v0 = vor.u32 %v3528_v44, %v3209_v43  ;;  %v315_v43 = vld [vmem:[%s6054_s2 + $0x480] sm:$0xff]  ;;  %v300_v44 = vld [vmem:[%s6054_s2 + $0x408] sm:$0xff] }
 0x181   :  { %v1317_v26 = vpack.c.bf16 %v1216_v62, %v1215_v10  ;;  %v1326_v45 = vpack.c.bf16 %v1234_v37, %v1233_v33  ;;  %2334 = vmatmul.bf16.gmra.mxu2 %v3170_v61  ;;  %v3019_v33 = vld [vmem:[%s6056_s0 + $0xd8] sm:$0xf0]  ;;  %v1213_v62 = vmul.f32 %v4722_v8, %v121_v48  ;;  %v1230_v10 = vmul.f32 %v4760_v5, %v138_v12  ;;  %v299_v8 = vld [vmem:[%s6054_s2 + $0x400] sm:$0xff]  ;;  %v3249_v12 = vld [vmem:[%s6056_s0 + $0x288] sm:$0xf] }
 0x182   :  { %v318_v5 = vld [vmem:[%s6054_s2 + $0x498] sm:$0xff] }
 0x183   :  { %2593 = vmatpush.bf16.msra.mxu2 %v1317_v26  ;;  %2666 = vmatpush.bf16.msra.mxu3 %v1326_v45  ;;  %v2172_v26 = vpop.f32.mrf.mxu0 }
 0x184   :  { %1069 = vperm.xlu2 %3601, %v319_v7   ;;  %994 = vperm.xlu1 %3600, %v304_v40   ;;  %v4834_v25 = vpop.f32.mrf.mxu2  ;;  %v2273_v20 = vpop.f32.mrf.mxu3  ;;  %v3022_v40 = vor.u32 %v3474_v23, %v3019_v33 }
 0x185   :  { %989 = vperm.xlu0 %3599, %v303_v22   ;;  %v4842_v35 = vpop.permute.xlu2 %934  ;;  %2531 = vmatmul.bf16.gmra.mxu1 %v2982_v18  ;;  %v4845_v21 = vadd.f32 %v2273_v20, %v4655_v2  ;;  %v317_v18 = vld [vmem:[%s6054_s2 + $0x490] sm:$0xff] }
 0x186   :  { %v955_v17 = vpop.permute.xlu1 %954  ;;  %v950_v57 = vpop.permute.xlu0 %949  ;;  %2457 = vmatmul.bf16.gmra.mxu0 %v2978_v4 }
 0x187   :  { %v1232_v9 = vmul.f32 %v955_v17, %v140_v31  ;;  %v1231_v28 = vmul.f32 %v950_v57, %v139_v42  ;;  %v2241_v63 = vpop.f32.mrf.mxu1  ;;  %v158_v31 = vld [vmem:[%s6055_s1 + $0x478] sm:$0xff]  ;;  %v157_v42 = vld [vmem:[%s6055_s1 + $0x470] sm:$0xff] }
 0x188   :  { %v4855_v27 = vadd.f32 %v2241_v63, %v2167_v56  ;;  %v3503_v63 = vld [vmem:[%s6056_s0 + $0x19c] sm:$0xf] }
 0x189   :  { %v1325_v2 = vpack.c.bf16 %v1232_v9, %v1231_v28 }
 0x18b   :  { %2667 = vmatpush.bf16.msra.mxu3 %v1325_v2  ;;  %v3131_v2 = vld [vmem:[%s6056_s0 + $0x1c0] sm:$0xf0] }
 0x18c   :  { %984 = vperm.xlu2 %3601, %v302_v41   ;;  %979 = vperm.xlu1 %3600, %v301_v16   ;;  %v4878_v46 = vpop.f32.mrf.mxu2  ;;  %v2276_v6 = vpop.f32.mrf.mxu3  ;;  %v3134_v48 = vor.u32 %v3503_v63, %v3131_v2 }
 0x18d   :  { %1074 = vperm.xlu0 %3599, %v320_v52   ;;  %v4886_v36 = vpop.permute.xlu2 %839  ;;  %v4889_v61 = vadd.f32 %v2276_v6, %v4676_v34  ;;  %v3017_v34 = vld [vmem:[%s6056_s0 + $0xb0] sm:$0xf]  ;;  %v4935_v16 = vpop.f32.mrf.mxu0  ;;  %v136_v6 = vld [vmem:[%s6055_s1 + $0x3c8] sm:$0xff] }
 0x18e   :  { %v940_v53 = vpop.permute.xlu1 %939  ;;  %v865_v24 = vpop.permute.xlu0 %864  ;;  %2398 = vmatmul.bf16.gmra.mxu3 %v3094_v50  ;;  %v3018_v22 = vor.u32 %v3479_v13, %v3017_v34  ;;  %v316_v50 = vld [vmem:[%s6054_s2 + $0x488] sm:$0xff]  ;;  %v3484_v34 = vld [vmem:[%s6056_s0 + $0x104] sm:$0xf] }
 0x18f   :  { %v1229_v37 = vmul.f32 %v940_v53, %v137_v55  ;;  %v1214_v39 = vmul.f32 %v865_v24, %v122_v49  ;;  %v4905_v56 = vpop.f32.mrf.mxu1  ;;  %v3538_v55 = vld [vmem:[%s6056_s0 + $0x2ac] sm:$0xf0]  ;;  %v119_v49 = vld [vmem:[%s6055_s1 + $0x340] sm:$0xff]  ;;  %v120_v24 = vld [vmem:[%s6055_s1 + $0x348] sm:$0xff] }
 0x190   :  { %v135_v53 = vld [vmem:[%s6055_s1 + $0x3c0] sm:$0xff]  ;;  %v3059_v13 = vld [vmem:[%s6056_s0 + $0x128] sm:$0xf0] }
 0x191   :  { %v1324_v45 = vpack.c.bf16 %v1230_v10, %v1229_v37  ;;  %v1316_v7 = vpack.c.bf16 %v1214_v39, %v1213_v62  ;;  %2339 = vmatmul.bf16.gmra.mxu2 %v3210_v0  ;;  %v3250_v10 = vor.u32 %v3538_v55, %v3249_v12 }
 0x193   :  { %2594 = vmatpush.bf16.msra.mxu2 %v1316_v7  ;;  %2668 = vmatpush.bf16.msra.mxu3 %v1324_v45  ;;  %v1228_v45 = vmul.f32 %v4842_v35, %v136_v6  ;;  %v3548_v6 = vld [vmem:[%s6056_s0 + $0x2fc] sm:$0xf0] }
 0x194   :  { %969 = vperm.xlu2 %3601, %v299_v8   ;;  %1064 = vperm.xlu1 %3600, %v318_v5   ;;  %v4916_v4 = vpop.f32.mrf.mxu2  ;;  %v2278_v20 = vpop.f32.mrf.mxu3  ;;  %v3489_v5 = vld [vmem:[%s6056_s0 + $0x124] sm:$0xf0] }
 0x195   :  { %1059 = vperm.xlu0 %3599, %v317_v18   ;;  %v4924_v17 = vpop.permute.xlu2 %924  ;;  %2536 = vmatmul.bf16.gmra.mxu1 %v3022_v40  ;;  %v4927_v57 = vadd.f32 %v2278_v20, %v4717_v1  ;;  %v2177_v18 = vpop.f32.mrf.mxu0  ;;  %v156_v20 = vld [vmem:[%s6055_s1 + $0x468] sm:$0xff] }
 0x196   :  { %v1045_v9 = vpop.permute.xlu1 %1044  ;;  %v1040_v28 = vpop.permute.xlu0 %1039  ;;  %2462 = vmatmul.bf16.gmra.mxu0 %v3018_v22 }
 0x197   :  { %v1250_v51 = vmul.f32 %v1045_v9, %v158_v31  ;;  %v1249_v3 = vmul.f32 %v1040_v28, %v157_v42  ;;  %v2246_v41 = vpop.f32.mrf.mxu1  ;;  %v3062_v42 = vor.u32 %v3484_v34, %v3059_v13 }
 0x198   :  { %v4937_v52 = vadd.f32 %v2246_v41, %v2172_v26  ;;  %v1211_v26 = vmul.f32 %v4804_v59, %v119_v49  ;;  %v3289_v49 = vld [vmem:[%s6056_s0 + $0x2d8] sm:$0xf] }
 0x199   :  { %v1334_v1 = vpack.c.bf16 %v1250_v51, %v1249_v3  ;;  %v155_v51 = vld [vmem:[%s6055_s1 + $0x460] sm:$0xff]  ;;  %v3290_v13 = vor.u32 %v3548_v6, %v3289_v49 }
 0x19b   :  { %2740 = vmatpush.bf16.msra.mxu0 %v1334_v1 }
 0x19c   :  { %1054 = vperm.xlu2 %3601, %v316_v50   ;;  %1049 = vperm.xlu1 %3600, %v315_v43   ;;  %v4960_v0 = vpop.f32.mrf.mxu2  ;;  %v2281_v23 = vpop.f32.mrf.mxu3  ;;  %v3513_v50 = vld [vmem:[%s6056_s0 + $0x1ec] sm:$0xf] }
 0x19d   :  { %974 = vperm.xlu0 %3599, %v300_v44   ;;  %v4968_v33 = vpop.permute.xlu2 %829  ;;  %v4971_v62 = vadd.f32 %v2281_v23, %v4755_v38  ;;  %v3057_v38 = vld [vmem:[%s6056_s0 + $0x100] sm:$0xf]  ;;  %v133_v23 = vld [vmem:[%s6055_s1 + $0x3b0] sm:$0xff] }
 0x19e   :  { %v930_v37 = vpop.permute.xlu1 %929  ;;  %v855_v39 = vpop.permute.xlu0 %854  ;;  %2403 = vmatmul.bf16.gmra.mxu3 %v3134_v48  ;;  %v3058_v59 = vor.u32 %v3489_v5, %v3057_v38 }
 0x19f   :  { %v1227_v7 = vmul.f32 %v930_v37, %v135_v53  ;;  %v1212_v8 = vmul.f32 %v855_v39, %v120_v24  ;;  %v4987_v40 = vpop.f32.mrf.mxu1  ;;  %v134_v53 = vld [vmem:[%s6055_s1 + $0x3b8] sm:$0xff]  ;;  %v117_v37 = vld [vmem:[%s6055_s1 + $0x330] sm:$0xff] }
 0x1a0   :  { %v118_v39 = vld [vmem:[%s6055_s1 + $0x338] sm:$0xff] }
 0x1a1   :  { %v1323_v22 = vpack.c.bf16 %v1228_v45, %v1227_v7  ;;  %v1315_v31 = vpack.c.bf16 %v1212_v8, %v1211_v26  ;;  %2344 = vmatmul.bf16.gmra.mxu2 %v3250_v10  ;;  %v3494_v45 = vld [vmem:[%s6056_s0 + $0x154] sm:$0xf]  ;;  %v3099_v7 = vld [vmem:[%s6056_s0 + $0x178] sm:$0xf0]  ;;  %v1226_v8 = vmul.f32 %v4924_v17, %v134_v53 }
 0x1a2   :  { %v3102_v17 = vor.u32 %v3494_v45, %v3099_v7  ;;  %v169_v7 = vld [vmem:[%s6055_s1 + $0x4d0] sm:$0xff] }
 0x1a3   :  { %2595 = vmatpush.bf16.msra.mxu2 %v1315_v31  ;;  %2669 = vmatpush.bf16.msra.mxu3 %v1323_v22  ;;  %v1209_v31 = vmul.f32 %v4886_v36, %v117_v37  ;;  %v153_v36 = vld [vmem:[%s6055_s1 + $0x450] sm:$0xff] }
 0x1a4   :  { %v2305_v35 = vpop.f32.mrf.mxu2  ;;  %v2283_v9 = vpop.f32.mrf.mxu3  ;;  %v3558_v37 = vld [vmem:[%s6056_s0 + $0x34c] sm:$0xf0] }
 0x1a5   :  { %v4993_v28 = vadd.f32 %v2305_v35, %v4691_v54  ;;  %2541 = vmatmul.bf16.gmra.mxu1 %v3062_v42  ;;  %v4999_v3 = vadd.f32 %v2283_v9, %v4796_v58  ;;  %v3171_v54 = vld [vmem:[%s6056_s0 + $0x210] sm:$0xf0]  ;;  %v5011_v58 = vpop.f32.mrf.mxu0 }
 0x1a6   :  { %v5001_v63 = vpop.permute.xlu2 %1104  ;;  %v1035_v2 = vpop.permute.xlu1 %1034  ;;  %2467 = vmatmul.bf16.gmra.mxu0 %v3058_v59  ;;  %v3174_v55 = vor.u32 %v3513_v50, %v3171_v54 }
 0x1a7   :  { %v1248_v41 = vmul.f32 %v1035_v2, %v156_v20  ;;  %v1030_v1 = vpop.permute.xlu0 %1029  ;;  %v2251_v43 = vpop.f32.mrf.mxu1 }
 0x1a8   :  { %v1247_v44 = vmul.f32 %v1030_v1, %v155_v51  ;;  %v5009_v48 = vadd.f32 %v2251_v43, %v2177_v18  ;;  %v3499_v18 = vld [vmem:[%s6056_s0 + $0x174] sm:$0xf0] }
 0x1aa   :  { %v1333_v12 = vpack.c.bf16 %v1248_v41, %v1247_v44  ;;  %v154_v41 = vld [vmem:[%s6055_s1 + $0x458] sm:$0xff] }
 0x1ac   :  { %2741 = vmatpush.bf16.msra.mxu0 %v1333_v12  ;;  %v5022_v24 = vpop.f32.mrf.mxu2  ;;  %v2286_v10 = vpop.f32.mrf.mxu3 }
 0x1ad   :  { %v5034_v34 = vadd.f32 %v2286_v10, %v4834_v25  ;;  %v3097_v25 = vld [vmem:[%s6056_s0 + $0x150] sm:$0xf]  ;;  %v2182_v20 = vpop.f32.mrf.mxu0 }
 0x1ae   :  { %v920_v26 = vpop.permute.xlu1 %919  ;;  %2408 = vmatmul.bf16.gmra.mxu3 %v3174_v55  ;;  %v5052_v59 = vpop.permute.xlu2 %1009  ;;  %v3098_v51 = vor.u32 %v3499_v18, %v3097_v25  ;;  %v3523_v55 = vld [vmem:[%s6056_s0 + $0x23c] sm:$0xf] }
 0x1af   :  { %v1225_v38 = vmul.f32 %v920_v26, %v133_v23  ;;  %v845_v5 = vpop.permute.xlu0 %844  ;;  %v5049_v22 = vpop.f32.mrf.mxu1  ;;  %v170_v26 = vld [vmem:[%s6055_s1 + $0x4d8] sm:$0xff] }
 0x1b0   :  { %v1210_v42 = vmul.f32 %v845_v5, %v118_v39  ;;  %v116_v5 = vld [vmem:[%s6055_s1 + $0x328] sm:$0xff] }
 0x1b1   :  { %v1322_v35 = vpack.c.bf16 %v1226_v8, %v1225_v38  ;;  %2349 = vmatmul.bf16.gmra.mxu2 %v3290_v13  ;;  %v115_v38 = vld [vmem:[%s6055_s1 + $0x320] sm:$0xff] }
 0x1b2   :  { %v1314_v9 = vpack.c.bf16 %v1210_v42, %v1209_v31  ;;  %v3504_v42 = vld [vmem:[%s6056_s0 + $0x1a4] sm:$0xf] }
 0x1b3   :  { %2670 = vmatpush.bf16.msra.mxu3 %v1322_v35  ;;  %v3139_v35 = vld [vmem:[%s6056_s0 + $0x1c8] sm:$0xf0] }
 0x1b4   :  { %2596 = vmatpush.bf16.msra.mxu2 %v1314_v9  ;;  %v2310_v2 = vpop.f32.mrf.mxu2  ;;  %v2288_v1 = vpop.f32.mrf.mxu3 }
 0x1b5   :  { %v5058_v50 = vadd.f32 %v2310_v2, %v4771_v30  ;;  %2546 = vmatmul.bf16.gmra.mxu1 %v3102_v17  ;;  %v5064_v54 = vadd.f32 %v2288_v1, %v4878_v46  ;;  %v3211_v30 = vld [vmem:[%s6056_s0 + $0x260] sm:$0xf0]  ;;  %v3329_v46 = vld [vmem:[%s6056_s0 + $0x328] sm:$0xf]  ;;  %v5082_v13 = vpop.f32.mrf.mxu0  ;;  %v1262_v17 = vmul.f32 %v5001_v63, %v170_v26 }
 0x1b6   :  { %v1025_v43 = vpop.permute.xlu1 %1024  ;;  %2472 = vmatmul.bf16.gmra.mxu0 %v3098_v51  ;;  %v3214_v10 = vor.u32 %v3523_v55, %v3211_v30  ;;  %v5080_v39 = vpop.permute.xlu2 %824  ;;  %v3330_v18 = vor.u32 %v3558_v37, %v3329_v46  ;;  %v3509_v51 = vld [vmem:[%s6056_s0 + $0x1c4] sm:$0xf0] }
 0x1b7   :  { %v1246_v44 = vmul.f32 %v1025_v43, %v154_v41  ;;  %v1020_v12 = vpop.permute.xlu0 %1019  ;;  %v2256_v49 = vpop.f32.mrf.mxu1  ;;  %v1207_v41 = vmul.f32 %v4968_v33, %v115_v38  ;;  %v3142_v43 = vor.u32 %v3504_v42, %v3139_v35  ;;  %v132_v55 = vld [vmem:[%s6055_s1 + $0x3a8] sm:$0xff]  ;;  %v131_v33 = vld [vmem:[%s6055_s1 + $0x3a0] sm:$0xff]  ;;  %v114_v35 = vld [vmem:[%s6055_s1 + $0x318] sm:$0xff] }
 0x1b8   :  { %v1245_v6 = vmul.f32 %v1020_v12, %v153_v36  ;;  %v5072_v53 = vadd.f32 %v2256_v49, %v2182_v20  ;;  %v3568_v42 = vld [vmem:[%s6056_s0 + $0x39c] sm:$0xf0] }
 0x1ba   :  { %v1332_v23 = vpack.c.bf16 %v1246_v44, %v1245_v6 }
 0x1bc   :  { %2742 = vmatpush.bf16.msra.mxu0 %v1332_v23  ;;  %v5087_v45 = vpop.f32.mrf.mxu2  ;;  %v2291_v8 = vpop.f32.mrf.mxu3 }
 0x1bd   :  { %v5099_v25 = vadd.f32 %v2291_v8, %v4916_v4  ;;  %v3137_v4 = vld [vmem:[%s6056_s0 + $0x1a0] sm:$0xf]  ;;  %v2187_v46 = vpop.f32.mrf.mxu0 }
 0x1be   :  { %v1100_v31 = vpop.permute.xlu1 %1099  ;;  %2413 = vmatmul.bf16.gmra.mxu3 %v3214_v10  ;;  %v3138_v63 = vor.u32 %v3509_v51, %v3137_v4  ;;  %v5120_v49 = vpop.permute.xlu2 %899  ;;  %v152_v4 = vld [vmem:[%s6055_s1 + $0x448] sm:$0xff] }
 0x1bf   :  { %v1261_v20 = vmul.f32 %v1100_v31, %v169_v7  ;;  %v835_v9 = vpop.permute.xlu0 %834  ;;  %v5114_v2 = vpop.f32.mrf.mxu1  ;;  %v3533_v7 = vld [vmem:[%s6056_s0 + $0x28c] sm:$0xf]  ;;  %v3369_v31 = vld [vmem:[%s6056_s0 + $0x378] sm:$0xf] }
 0x1c0   :  { %v1208_v1 = vmul.f32 %v835_v9, %v116_v5  ;;  %v151_v9 = vld [vmem:[%s6055_s1 + $0x440] sm:$0xff]  ;;  %v3370_v51 = vor.u32 %v3568_v42, %v3369_v31 }
 0x1c1   :  { %v1340_v36 = vpack.c.bf16 %v1262_v17, %v1261_v20  ;;  %2354 = vmatmul.bf16.gmra.mxu2 %v3330_v18  ;;  %v113_v20 = vld [vmem:[%s6055_s1 + $0x310] sm:$0xff] }
 0x1c2   :  { %v1313_v44 = vpack.c.bf16 %v1208_v1, %v1207_v41  ;;  %v3514_v1 = vld [vmem:[%s6056_s0 + $0x1f4] sm:$0xf] }
 0x1c3   :  { %2816 = vmatpush.bf16.msra.mxu1 %v1340_v36  ;;  %v3179_v36 = vld [vmem:[%s6056_s0 + $0x218] sm:$0xf0] }
 0x1c4   :  { %2597 = vmatpush.bf16.msra.mxu2 %v1313_v44  ;;  %v2315_v12 = vpop.f32.mrf.mxu2  ;;  %v2293_v30 = vpop.f32.mrf.mxu3 }
 0x1c5   :  { %v5123_v6 = vadd.f32 %v2315_v12, %v4855_v27  ;;  %2551 = vmatmul.bf16.gmra.mxu1 %v3142_v43  ;;  %v5129_v23 = vadd.f32 %v2293_v30, %v4960_v0  ;;  %v3251_v27 = vld [vmem:[%s6056_s0 + $0x2b0] sm:$0xf0]  ;;  %v1206_v43 = vmul.f32 %v5080_v39, %v114_v35  ;;  %v3177_v12 = vld [vmem:[%s6056_s0 + $0x1f0] sm:$0xf]  ;;  %v1243_v30 = vmul.f32 %v5052_v59, %v151_v9  ;;  %v3543_v35 = vld [vmem:[%s6056_s0 + $0x2dc] sm:$0xf] }
 0x1c6   :  { %v915_v10 = vpop.permute.xlu1 %914  ;;  %2477 = vmatmul.bf16.gmra.mxu0 %v3138_v63  ;;  %v3254_v0 = vor.u32 %v3533_v7, %v3251_v27 }
 0x1c7   :  { %v1224_v37 = vmul.f32 %v915_v10, %v132_v55  ;;  %v910_v26 = vpop.permute.xlu0 %909  ;;  %v2261_v8 = vpop.f32.mrf.mxu1  ;;  %v3519_v55 = vld [vmem:[%s6056_s0 + $0x214] sm:$0xf0] }
 0x1c8   :  { %v1223_v38 = vmul.f32 %v910_v26, %v131_v33  ;;  %v5137_v5 = vadd.f32 %v2261_v8, %v2187_v46  ;;  %v1005_v33 = vpop.permute.xlu2 %1004  ;;  %v3182_v26 = vor.u32 %v3514_v1, %v3179_v36  ;;  %v3178_v27 = vor.u32 %v3519_v55, %v3177_v12  ;;  %v3409_v1 = vld [vmem:[%s6056_s0 + $0x3c8] sm:$0xf]  ;;  %v3578_v36 = vld [vmem:[%s6056_s0 + $0x3ec] sm:$0xf0]  ;;  %v130_v12 = vld [vmem:[%s6055_s1 + $0x398] sm:$0xff] }
 0x1c9   :  { %v3410_v55 = vor.u32 %v3578_v36, %v3409_v1  ;;  %v3553_v36 = vld [vmem:[%s6056_s0 + $0x32c] sm:$0xf] }
 0x1ca   :  { %v1321_v18 = vpack.c.bf16 %v1224_v37, %v1223_v38  ;;  %v168_v38 = vld [vmem:[%s6055_s1 + $0x4c8] sm:$0xff] }
 0x1cc   :  { %2671 = vmatpush.bf16.msra.mxu3 %v1321_v18  ;;  %v5148_v17 = vpop.f32.mrf.mxu2  ;;  %v167_v18 = vld [vmem:[%s6055_s1 + $0x4c0] sm:$0xff] }
 0x1ce   :  { %v820_v41 = vpop.permute.xlu1 %819  ;;  %2418 = vmatmul.bf16.gmra.mxu3 %v3254_v0 }
 0x1cf   :  { %v1205_v44 = vmul.f32 %v820_v41, %v113_v20  ;;  %v1015_v63 = vpop.permute.xlu0 %1014 }
 0x1d0   :  { %v1244_v10 = vmul.f32 %v1015_v63, %v152_v4  ;;  %v129_v63 = vld [vmem:[%s6055_s1 + $0x390] sm:$0xff] }
 0x1d1   :  { %v1312_v46 = vpack.c.bf16 %v1206_v43, %v1205_v44  ;;  %v2379_v37 = vpop.f32.mrf.mxu3  ;;  %2359 = vmatmul.bf16.gmra.mxu2 %v3370_v51  ;;  %v5194_v51 = vpop.permute.xlu2 %1079  ;;  %v149_v44 = vld [vmem:[%s6055_s1 + $0x430] sm:$0xff] }
 0x1d2   :  { %v1331_v7 = vpack.c.bf16 %v1244_v10, %v1243_v30  ;;  %v5174_v39 = vadd.f32 %v2379_v37, %v4993_v28  ;;  %v2234_v28 = vadd.f32 %v4734_v19, %v4681_v11  ;;  %v3524_v10 = vld [vmem:[%s6056_s0 + $0x244] sm:$0xf] }
 0x1d3   :  { %2598 = vmatpush.bf16.msra.mxu2 %v1312_v46  ;;  %v3219_v46 = vld [vmem:[%s6056_s0 + $0x268] sm:$0xf0] }
 0x1d4   :  { %2743 = vmatpush.bf16.msra.mxu0 %v1331_v7  ;;  %v2320_v8 = vpop.f32.mrf.mxu2  ;;  %v2308_v20 = vadd.f32 %v5022_v24, %v2234_v28  ;;  %v150_v24 = vld [vmem:[%s6055_s1 + $0x438] sm:$0xff] }
 0x1d5   :  { %v5180_v59 = vadd.f32 %v2320_v8, %v4937_v52  ;;  %2556 = vmatmul.bf16.gmra.mxu1 %v3182_v26  ;;  %v3291_v52 = vld [vmem:[%s6056_s0 + $0x300] sm:$0xf0]  ;;  %v1242_v37 = vmul.f32 %v1005_v33, %v150_v24  ;;  %v3529_v8 = vld [vmem:[%s6056_s0 + $0x264] sm:$0xf0] }
 0x1d6   :  { %v1095_v0 = vpop.permute.xlu1 %1094  ;;  %2482 = vmatmul.bf16.gmra.mxu0 %v3178_v27  ;;  %v3294_v19 = vor.u32 %v3543_v35, %v3291_v52  ;;  %v3217_v27 = vld [vmem:[%s6056_s0 + $0x240] sm:$0xf] }
 0x1d7   :  { %v1260_v31 = vmul.f32 %v1095_v0, %v168_v38  ;;  %v1090_v42 = vpop.permute.xlu0 %1089  ;;  %v1221_v38 = vmul.f32 %v5120_v49, %v129_v63  ;;  %v3218_v35 = vor.u32 %v3529_v8, %v3217_v27  ;;  %v166_v27 = vld [vmem:[%s6055_s1 + $0x4b8] sm:$0xff] }
 0x1d8   :  { %v1259_v9 = vmul.f32 %v1090_v42, %v167_v18 }
 0x1d9   :  { %v2381_v4 = vpop.f32.mrf.mxu3  ;;  %v895_v52 = vpop.permute.xlu2 %894 }
 0x1da   :  { %v1339_v41 = vpack.c.bf16 %v1260_v31, %v1259_v9  ;;  %v5196_v11 = vadd.f32 %v2381_v4, %v2308_v20  ;;  %v3222_v31 = vor.u32 %v3524_v10, %v3219_v46  ;;  %v112_v9 = vld [vmem:[%s6055_s1 + $0x308] sm:$0xff]  ;;  %v111_v4 = vld [vmem:[%s6055_s1 + $0x300] sm:$0xff]  ;;  %v5262_v46 = vpop.f32.mrf.mxu0 }
 0x1db   :  { %v3460_v10 = vld [vmem:[%s6056_s0 + $0x3c] sm:$0xf0] }
 0x1dc   :  { %2817 = vmatpush.bf16.msra.mxu1 %v1339_v41  ;;  %v5207_v43 = vpop.f32.mrf.mxu2 }
 0x1de   :  { %v1000_v30 = vpop.permute.xlu1 %999  ;;  %2423 = vmatmul.bf16.gmra.mxu3 %v3294_v19 }
 0x1df   :  { %v1241_v26 = vmul.f32 %v1000_v30, %v149_v44  ;;  %v905_v7 = vpop.permute.xlu0 %904  ;;  %v2945_v30 = vld [vmem:[%s6056_s0 + $0x18] sm:$0xf] }
 0x1e0   :  { %v1222_v18 = vmul.f32 %v905_v7, %v130_v12  ;;  %v165_v7 = vld [vmem:[%s6055_s1 + $0x4b0] sm:$0xff]  ;;  %v2946_v8 = vor.u32 %v3460_v10, %v2945_v30  ;;  %v2244_v30 = vadd.f32 %v4905_v56, %v4853_v32 }
 0x1e1   :  { %v1330_v28 = vpack.c.bf16 %v1242_v37, %v1241_v26  ;;  %v2384_v0 = vpop.f32.mrf.mxu3  ;;  %2364 = vmatmul.bf16.gmra.mxu2 %v3410_v55  ;;  %v127_v26 = vld [vmem:[%s6055_s1 + $0x380] sm:$0xff] }
 0x1e2   :  { %v1320_v42 = vpack.c.bf16 %v1222_v18, %v1221_v38  ;;  %v5232_v33 = vadd.f32 %v2384_v0, %v5058_v50  ;;  %v2239_v50 = vadd.f32 %v4823_v14, %v4773_v15  ;;  %v5254_v15 = vpop.f32.mrf.mxu1  ;;  %v5278_v38 = vpop.permute.xlu2 %1069  ;;  %v3259_v0 = vld [vmem:[%s6056_s0 + $0x2b8] sm:$0xf0] }
 0x1e3   :  { %2744 = vmatpush.bf16.msra.mxu0 %v1330_v28  ;;  %v3534_v28 = vld [vmem:[%s6056_s0 + $0x294] sm:$0xf] }
 0x1e4   :  { %2672 = vmatpush.bf16.msra.mxu3 %v1320_v42  ;;  %v2325_v20 = vpop.f32.mrf.mxu2  ;;  %v2313_v24 = vadd.f32 %v5087_v45, %v2239_v50  ;;  %v128_v45 = vld [vmem:[%s6055_s1 + $0x388] sm:$0xff] }
 0x1e5   :  { %v5238_v49 = vadd.f32 %v2325_v20, %v5009_v48  ;;  %2561 = vmatmul.bf16.gmra.mxu1 %v3222_v31  ;;  %v3331_v48 = vld [vmem:[%s6056_s0 + $0x350] sm:$0xf0]  ;;  %v1220_v31 = vmul.f32 %v895_v52, %v128_v45  ;;  %v3257_v20 = vld [vmem:[%s6056_s0 + $0x290] sm:$0xf] }
 0x1e6   :  { %v815_v41 = vpop.permute.xlu1 %814  ;;  %2487 = vmatmul.bf16.gmra.mxu0 %v3218_v35  ;;  %v3334_v14 = vor.u32 %v3553_v36, %v3331_v48 }
 0x1e7   :  { %v1204_v19 = vmul.f32 %v815_v41, %v112_v9  ;;  %v810_v1 = vpop.permute.xlu0 %809  ;;  %v3539_v9 = vld [vmem:[%s6056_s0 + $0x2b4] sm:$0xf0] }
 0x1e8   :  { %v1203_v44 = vmul.f32 %v810_v1, %v111_v4  ;;  %v1257_v4 = vmul.f32 %v5194_v51, %v165_v7  ;;  %v3262_v1 = vor.u32 %v3534_v28, %v3259_v0  ;;  %v148_v51 = vld [vmem:[%s6055_s1 + $0x428] sm:$0xff]  ;;  %v3563_v7 = vld [vmem:[%s6056_s0 + $0x37c] sm:$0xf] }
 0x1e9   :  { %v2386_v63 = vpop.f32.mrf.mxu3 }
 0x1ea   :  { %v1311_v12 = vpack.c.bf16 %v1204_v19, %v1203_v44  ;;  %v5252_v55 = vadd.f32 %v2386_v63, %v2313_v24  ;;  %v3258_v24 = vor.u32 %v3539_v9, %v3257_v20 }
 0x1ec   :  { %2599 = vmatpush.bf16.msra.mxu2 %v1311_v12  ;;  %v5267_v37 = vpop.f32.mrf.mxu2 }
 0x1ee   :  { %v890_v18 = vpop.permute.xlu1 %889  ;;  %2428 = vmatmul.bf16.gmra.mxu3 %v3334_v14 }
 0x1ef   :  { %v1219_v42 = vmul.f32 %v890_v18, %v127_v26  ;;  %v1085_v35 = vpop.permute.xlu0 %1084 }
 0x1f0   :  { %v1258_v50 = vmul.f32 %v1085_v35, %v166_v27  ;;  %v2318_v27 = vadd.f32 %v5148_v17, %v2244_v30  ;;  %v3470_v35 = vld [vmem:[%s6056_s0 + $0x8c] sm:$0xf0]  ;;  %v146_v17 = vld [vmem:[%s6055_s1 + $0x418] sm:$0xff] }
 0x1f1   :  { %v1319_v41 = vpack.c.bf16 %v1220_v31, %v1219_v42  ;;  %v2389_v19 = vpop.f32.mrf.mxu3  ;;  %2600 = vmatmul.bf16.vlgmr.msra.gmra.mxu2 %v2946_v8  ;;  %v985_v8 = vpop.permute.xlu2 %984  ;;  %v2985_v42 = vld [vmem:[%s6056_s0 + $0x68] sm:$0xf] }
 0x1f2   :  { %v1338_v36 = vpack.c.bf16 %v1258_v50, %v1257_v4  ;;  %v5294_v52 = vadd.f32 %v2389_v19, %v5123_v6  ;;  %v2527_v48 = vpop.f32.mrf.mxu1  ;;  %v147_v6 = vld [vmem:[%s6055_s1 + $0x420] sm:$0xff]  ;;  %v145_v50 = vld [vmem:[%s6055_s1 + $0x410] sm:$0xff]  ;;  %v164_v19 = vld [vmem:[%s6055_s1 + $0x4a8] sm:$0xff] }
 0x1f3   :  { %v2453_v44 = vpop.f32.mrf.mxu0  ;;  %2673 = vmatpush.bf16.msra.mxu3 %v1319_v41  ;;  %v163_v41 = vld [vmem:[%s6055_s1 + $0x4a0] sm:$0xff] }
 0x1f4   :  { %v2454_v63 = vadd.f32 %v2453_v44, %v5174_v39  ;;  %2818 = vmatpush.bf16.msra.mxu1 %v1338_v36  ;;  %v2330_v12 = vpop.f32.mrf.mxu2  ;;  %v1238_v44 = vmul.f32 %v985_v8, %v146_v17  ;;  %v1255_v30 = vmul.f32 %v5278_v38, %v163_v41  ;;  %v162_v38 = vld [vmem:[%s6055_s1 + $0x498] sm:$0xff] }
 0x1f5   :  { %v5301_v14 = vadd.f32 %v2330_v12, %v5072_v53  ;;  %2566 = vmatmul.bf16.gmra.mxu1 %v3262_v1  ;;  %v3371_v53 = vld [vmem:[%s6056_s0 + $0x3a0] sm:$0xf0]  ;;  %v2986_v1 = vor.u32 %v3470_v35, %v2985_v42  ;;  %v2249_v35 = vadd.f32 %v4987_v40, %v4935_v16 }
 0x1f6   :  { %v5308_v10 = vadd.f32 %v2527_v48, %v2454_v63  ;;  %v995_v39 = vpop.permute.xlu1 %994  ;;  %2492 = vmatmul.bf16.gmra.mxu0 %v3258_v24  ;;  %v3374_v31 = vor.u32 %v3563_v7, %v3371_v53  ;;  %v3299_v24 = vld [vmem:[%s6056_s0 + $0x308] sm:$0xf0] }
 0x1f7   :  { %v1240_v45 = vmul.f32 %v995_v39, %v148_v51  ;;  %v990_v26 = vpop.permute.xlu0 %989  ;;  %v3297_v51 = vld [vmem:[%s6056_s0 + $0x2e0] sm:$0xf]  ;;  %v2323_v41 = vadd.f32 %v5207_v43, %v2249_v35  ;;  %v160_v43 = vld [vmem:[%s6055_s1 + $0x488] sm:$0xff] }
 0x1f8   :  { %v1239_v18 = vmul.f32 %v990_v26, %v147_v6  ;;  %v3549_v6 = vld [vmem:[%s6056_s0 + $0x304] sm:$0xf0] }
 0x1f9   :  { %v2391_v28 = vpop.f32.mrf.mxu3  ;;  %v970_v53 = vpop.permute.xlu2 %969 }
 0x1fa   :  { %v1329_v32 = vpack.c.bf16 %v1240_v45, %v1239_v18  ;;  %v5317_v56 = vadd.f32 %v2391_v28, %v2318_v27  ;;  %v2529_v0 = vpop.f32.mrf.mxu1  ;;  %v3298_v28 = vor.u32 %v3549_v6, %v3297_v51 }
 0x1fb   :  { %v2455_v20 = vpop.f32.mrf.mxu0 }
 0x1fc   :  { %v2456_v9 = vadd.f32 %v2455_v20, %v5196_v11  ;;  %2745 = vmatpush.bf16.msra.mxu0 %v1329_v32  ;;  %v5329_v4 = vpop.f32.mrf.mxu2  ;;  %v3544_v11 = vld [vmem:[%s6056_s0 + $0x2e4] sm:$0xf] }
 0x1fd   :  { %v3302_v7 = vor.u32 %v3544_v11, %v3299_v24  ;;  %v3025_v24 = vld [vmem:[%s6056_s0 + $0xb8] sm:$0xf] }
 0x1fe   :  { %v5340_v36 = vadd.f32 %v2529_v0, %v2456_v9  ;;  %v980_v48 = vpop.permute.xlu1 %979  ;;  %2433 = vmatmul.bf16.gmra.mxu3 %v3374_v31 }
 0x1ff   :  { %v1237_v63 = vmul.f32 %v980_v48, %v145_v50  ;;  %v1075_v12 = vpop.permute.xlu0 %1074  ;;  %v3573_v50 = vld [vmem:[%s6056_s0 + $0x3cc] sm:$0xf] }
 0x200   :  { %v1256_v39 = vmul.f32 %v1075_v12, %v164_v19 }
 0x201   :  { %v1328_v45 = vpack.c.bf16 %v1238_v44, %v1237_v63  ;;  %v2394_v26 = vpop.f32.mrf.mxu3  ;;  %2605 = vmatmul.bf16.gmra.mxu2 %v2986_v1  ;;  %v3480_v44 = vld [vmem:[%s6056_s0 + $0xdc] sm:$0xf0]  ;;  %v1055_v12 = vpop.permute.xlu2 %1054 }
 0x202   :  { %v1337_v27 = vpack.c.bf16 %v1256_v39, %v1255_v30  ;;  %v5356_v8 = vadd.f32 %v2394_v26, %v5180_v59  ;;  %v2532_v18 = vpop.f32.mrf.mxu1  ;;  %v161_v59 = vld [vmem:[%s6055_s1 + $0x490] sm:$0xff]  ;;  %v159_v30 = vld [vmem:[%s6055_s1 + $0x480] sm:$0xff]  ;;  %v3026_v26 = vor.u32 %v3480_v44, %v3025_v24 }
 0x203   :  { %v2458_v32 = vpop.f32.mrf.mxu0  ;;  %2746 = vmatpush.bf16.msra.mxu0 %v1328_v45  ;;  %v143_v39 = vld [vmem:[%s6055_s1 + $0x400] sm:$0xff]  ;;  %v144_v45 = vld [vmem:[%s6055_s1 + $0x408] sm:$0xff] }
 0x204   :  { %v2459_v0 = vadd.f32 %v2458_v32, %v5232_v33  ;;  %2819 = vmatpush.bf16.msra.mxu1 %v1337_v27  ;;  %v2335_v31 = vpop.f32.mrf.mxu2 }
 0x205   :  { %v5363_v42 = vadd.f32 %v2335_v31, %v5137_v5  ;;  %2571 = vmatmul.bf16.gmra.mxu1 %v3302_v7  ;;  %v3411_v5 = vld [vmem:[%s6056_s0 + $0x3f0] sm:$0xf0]  ;;  %v3337_v31 = vld [vmem:[%s6056_s0 + $0x330] sm:$0xf] }
 0x206   :  { %v5370_v20 = vadd.f32 %v2532_v18, %v2459_v0  ;;  %v1065_v33 = vpop.permute.xlu1 %1064  ;;  %2497 = vmatmul.bf16.gmra.mxu0 %v3298_v28  ;;  %v3414_v11 = vor.u32 %v3573_v50, %v3411_v5  ;;  %v3339_v18 = vld [vmem:[%s6056_s0 + $0x358] sm:$0xf0]  ;;  %v1252_v28 = vmul.f32 %v1055_v12, %v160_v43 }
 0x207   :  { %v1254_v17 = vmul.f32 %v1065_v33, %v162_v38  ;;  %v1060_v9 = vpop.permute.xlu0 %1059  ;;  %v3559_v38 = vld [vmem:[%s6056_s0 + $0x354] sm:$0xf0] }
 0x208   :  { %v1253_v19 = vmul.f32 %v1060_v9, %v161_v59  ;;  %v1235_v59 = vmul.f32 %v970_v53, %v143_v39  ;;  %v2254_v53 = vadd.f32 %v5049_v22, %v5011_v58  ;;  %v3065_v58 = vld [vmem:[%s6056_s0 + $0x108] sm:$0xf]  ;;  %v3490_v22 = vld [vmem:[%s6056_s0 + $0x12c] sm:$0xf0] }
 0x209   :  { %v2396_v1 = vpop.f32.mrf.mxu3 }
 0x20a   :  { %v1336_v48 = vpack.c.bf16 %v1254_v17, %v1253_v19  ;;  %v5379_v16 = vadd.f32 %v2396_v1, %v2323_v41  ;;  %v2534_v40 = vpop.f32.mrf.mxu1  ;;  %v3338_v19 = vor.u32 %v3559_v38, %v3337_v31  ;;  %v2328_v44 = vadd.f32 %v5267_v37, %v2254_v53 }
 0x20b   :  { %v2460_v63 = vpop.f32.mrf.mxu0  ;;  %v3066_v37 = vor.u32 %v3490_v22, %v3065_v58 }
 0x20c   :  { %v2461_v51 = vadd.f32 %v2460_v63, %v5252_v55  ;;  %2820 = vmatpush.bf16.msra.mxu1 %v1336_v48  ;;  %v5391_v6 = vpop.f32.mrf.mxu2  ;;  %v3554_v55 = vld [vmem:[%s6056_s0 + $0x334] sm:$0xf] }
 0x20d   :  { %v3342_v9 = vor.u32 %v3554_v55, %v3339_v18  ;;  %v3379_v55 = vld [vmem:[%s6056_s0 + $0x3a8] sm:$0xf0] }
 0x20e   :  { %v5402_v7 = vadd.f32 %v2534_v40, %v2461_v51  ;;  %v1050_v27 = vpop.permute.xlu1 %1049  ;;  %2438 = vmatmul.bf16.gmra.mxu3 %v3414_v11 }
 0x20f   :  { %v1251_v32 = vmul.f32 %v1050_v27, %v159_v30  ;;  %v975_v0 = vpop.permute.xlu0 %974  ;;  %v3564_v27 = vld [vmem:[%s6056_s0 + $0x384] sm:$0xf] }
 0x210   :  { %v1236_v35 = vmul.f32 %v975_v0, %v144_v45 }
 0x211   :  { %v1335_v33 = vpack.c.bf16 %v1252_v28, %v1251_v32  ;;  %v2399_v17 = vpop.f32.mrf.mxu3  ;;  %2610 = vmatmul.bf16.gmra.mxu2 %v3026_v26  ;;  %v3382_v28 = vor.u32 %v3564_v27, %v3379_v55  ;;  %v2264_v55 = vadd.f32 %v5254_v15, %v5262_v46  ;;  %v3145_v15 = vld [vmem:[%s6056_s0 + $0x1a8] sm:$0xf]  ;;  %v3510_v46 = vld [vmem:[%s6056_s0 + $0x1cc] sm:$0xf0] }
 0x212   :  { %v1327_v50 = vpack.c.bf16 %v1236_v35, %v1235_v59  ;;  %v5417_v5 = vadd.f32 %v2399_v17, %v5238_v49  ;;  %v2537_v41 = vpop.f32.mrf.mxu1  ;;  %v3455_v49 = vld [vmem:[%s6056_s0 + $0x1c] sm:$0xf]  ;;  %v2259_v17 = vadd.f32 %v5114_v2, %v5082_v13  ;;  %v3105_v13 = vld [vmem:[%s6056_s0 + $0x158] sm:$0xf]  ;;  %v3500_v2 = vld [vmem:[%s6056_s0 + $0x17c] sm:$0xf0] }
 0x213   :  { %v2463_v1 = vpop.f32.mrf.mxu0  ;;  %2821 = vmatpush.bf16.msra.mxu1 %v1335_v33 }
 0x214   :  { %v2464_v48 = vadd.f32 %v2463_v1, %v5294_v52  ;;  %2747 = vmatpush.bf16.msra.mxu0 %v1327_v50  ;;  %v2340_v40 = vpop.f32.mrf.mxu2  ;;  %v2947_v52 = vld [vmem:[%s6056_s0 + $0x40] sm:$0xf0]  ;;  %v2987_v50 = vld [vmem:[%s6056_s0 + $0x90] sm:$0xf0] }
 0x215   :  { %v5421_v11 = vadd.f32 %v2340_v40, %v4725_v47  ;;  %2576 = vmatmul.bf16.gmra.mxu1 %v3342_v9  ;;  %v2950_v43 = vor.u32 %v3455_v49, %v2947_v52 }
 0x216   :  { %v5425_v24 = vadd.f32 %v2537_v41, %v2464_v48  ;;  %2502 = vmatmul.bf16.gmra.mxu0 %v3338_v19 }
 0x219   :  { %v2401_v63 = vpop.f32.mrf.mxu3 }
 0x21a   :  { %v5434_v47 = vadd.f32 %v2401_v63, %v2328_v44  ;;  %v2539_v12 = vpop.f32.mrf.mxu1  ;;  %v3574_v44 = vld [vmem:[%s6056_s0 + $0x3d4] sm:$0xf]  ;;  %v3419_v63 = vld [vmem:[%s6056_s0 + $0x3f8] sm:$0xf0] }
 0x21b   :  { %v2465_v51 = vpop.f32.mrf.mxu0 }
 0x21c   :  { %v2466_v30 = vadd.f32 %v2465_v51, %v5317_v56  ;;  %v2342_v39 = vpop.f32.mrf.mxu2  ;;  %v3377_v56 = vld [vmem:[%s6056_s0 + $0x380] sm:$0xf] }
 0x21d   :  { %v5444_v45 = vadd.f32 %v2342_v39, %v4763_v29  ;;  %v3569_v29 = vld [vmem:[%s6056_s0 + $0x3a4] sm:$0xf0] }
 0x21e   :  { %v5446_v26 = vadd.f32 %v2539_v12, %v2466_v30  ;;  %2674 = vmatmul.bf16.vlgmr.msra.gmra.mxu3 %v2950_v43  ;;  %v3378_v31 = vor.u32 %v3569_v29, %v3377_v56  ;;  %v3422_v43 = vor.u32 %v3574_v44, %v3419_v63  ;;  %v3027_v29 = vld [vmem:[%s6056_s0 + $0xe0] sm:$0xf0]  ;;  %v3067_v44 = vld [vmem:[%s6056_s0 + $0x130] sm:$0xf0] }
 0x221   :  { %v2404_v18 = vpop.f32.mrf.mxu3  ;;  %2615 = vmatmul.bf16.gmra.mxu2 %v3066_v37 }
 0x222   :  { %v5461_v32 = vadd.f32 %v2404_v18, %v5301_v14  ;;  %v2542_v0 = vpop.f32.mrf.mxu1  ;;  %v3465_v14 = vld [vmem:[%s6056_s0 + $0x6c] sm:$0xf] }
 0x223   :  { %v2468_v38 = vpop.f32.mrf.mxu0  ;;  %v2990_v1 = vor.u32 %v3465_v14, %v2987_v50  ;;  %v3456_v14 = vld [vmem:[%s6056_s0 + $0x24] sm:$0xf]  ;;  %v2955_v50 = vld [vmem:[%s6056_s0 + $0x48] sm:$0xf0] }
 0x224   :  { %v2469_v59 = vadd.f32 %v2468_v38, %v5356_v8  ;;  %v2345_v35 = vpop.f32.mrf.mxu2  ;;  %v2333_v8 = vadd.f32 %v5329_v4, %v2259_v17  ;;  %v3106_v4 = vor.u32 %v3500_v2, %v3105_v13 }
 0x225   :  { %v5465_v33 = vadd.f32 %v2345_v35, %v4807_v60  ;;  %2581 = vmatmul.bf16.gmra.mxu1 %v3382_v28 }
 0x226   :  { %v5469_v9 = vadd.f32 %v2542_v0, %v2469_v59  ;;  %2507 = vmatmul.bf16.gmra.mxu0 %v3378_v31 }
 0x229   :  { %v2406_v41 = vpop.f32.mrf.mxu3 }
 0x22a   :  { %v5478_v60 = vadd.f32 %v2406_v41, %v2333_v8  ;;  %v2544_v19 = vpop.f32.mrf.mxu1  ;;  %v2958_v41 = vor.u32 %v3456_v14, %v2955_v50  ;;  %v3225_v50 = vld [vmem:[%s6056_s0 + $0x248] sm:$0xf] }
 0x22b   :  { %v2470_v48 = vpop.f32.mrf.mxu0 }
 0x22c   :  { %v2471_v40 = vadd.f32 %v2470_v48, %v5379_v16  ;;  %v2347_v53 = vpop.f32.mrf.mxu2  ;;  %v3417_v16 = vld [vmem:[%s6056_s0 + $0x3d0] sm:$0xf] }
 0x22d   :  { %v5488_v49 = vadd.f32 %v2347_v53, %v4845_v21  ;;  %v3579_v21 = vld [vmem:[%s6056_s0 + $0x3f4] sm:$0xf0] }
 0x22e   :  { %v5490_v52 = vadd.f32 %v2544_v19, %v2471_v40  ;;  %2679 = vmatmul.bf16.gmra.mxu3 %v2990_v1  ;;  %v3418_v51 = vor.u32 %v3579_v21, %v3417_v16  ;;  %v3185_v21 = vld [vmem:[%s6056_s0 + $0x1f8] sm:$0xf] }
 0x231   :  { %v2409_v12 = vpop.f32.mrf.mxu3  ;;  %2620 = vmatmul.bf16.gmra.mxu2 %v3106_v4 }
 0x232   :  { %v5505_v58 = vadd.f32 %v2409_v12, %v5363_v42  ;;  %v2547_v22 = vpop.f32.mrf.mxu1  ;;  %v3475_v42 = vld [vmem:[%s6056_s0 + $0xbc] sm:$0xf]  ;;  %v3520_v12 = vld [vmem:[%s6056_s0 + $0x21c] sm:$0xf0] }
 0x233   :  { %v2473_v30 = vpop.f32.mrf.mxu0  ;;  %v3030_v0 = vor.u32 %v3475_v42, %v3027_v29 }
 0x234   :  { %v2474_v39 = vadd.f32 %v2473_v30, %v5417_v5  ;;  %v2350_v37 = vpop.f32.mrf.mxu2  ;;  %v2338_v5 = vadd.f32 %v5391_v6, %v2264_v55  ;;  %v3146_v6 = vor.u32 %v3510_v46, %v3145_v15  ;;  %v2995_v55 = vld [vmem:[%s6056_s0 + $0x98] sm:$0xf0] }
 0x235   :  { %v5509_v27 = vadd.f32 %v2350_v37, %v4889_v61  ;;  %2586 = vmatmul.bf16.gmra.mxu1 %v3422_v43  ;;  %v3466_v37 = vld [vmem:[%s6056_s0 + $0x74] sm:$0xf] }
 0x236   :  { %v5513_v56 = vadd.f32 %v2547_v22, %v2474_v39  ;;  %2512 = vmatmul.bf16.gmra.mxu0 %v3418_v51  ;;  %v3186_v39 = vor.u32 %v3520_v12, %v3185_v21  ;;  %v2998_v29 = vor.u32 %v3466_v37, %v2995_v55  ;;  %v3265_v55 = vld [vmem:[%s6056_s0 + $0x298] sm:$0xf] }
 0x239   :  { %v2411_v18 = vpop.f32.mrf.mxu3 }
 0x23a   :  { %v5522_v61 = vadd.f32 %v2411_v18, %v2338_v5  ;;  %v2549_v28 = vpop.f32.mrf.mxu1 }
 0x23b   :  { %v2475_v31 = vpop.f32.mrf.mxu0 }
 0x23c   :  { %v2476_v38 = vadd.f32 %v2475_v31, %v5434_v47  ;;  %v2352_v59 = vpop.f32.mrf.mxu2  ;;  %v2953_v47 = vld [vmem:[%s6056_s0 + $0x20] sm:$0xf] }
 0x23d   :  { %v5532_v35 = vadd.f32 %v2352_v59, %v4927_v57  ;;  %v3461_v57 = vld [vmem:[%s6056_s0 + $0x44] sm:$0xf0]  ;;  %v3495_v59 = vld [vmem:[%s6056_s0 + $0x15c] sm:$0xf] }
 0x23e   :  { %v5534_v17 = vadd.f32 %v2549_v28, %v2476_v38  ;;  %2684 = vmatmul.bf16.gmra.mxu3 %v3030_v0  ;;  %v2954_v13 = vor.u32 %v3461_v57, %v2953_v47  ;;  %v3530_v47 = vld [vmem:[%s6056_s0 + $0x26c] sm:$0xf0] }
 0x241   :  { %v2414_v8 = vpop.f32.mrf.mxu3  ;;  %2625 = vmatmul.bf16.gmra.mxu2 %v3146_v6 }
 0x242   :  { %v5549_v19 = vadd.f32 %v2414_v8, %v5421_v11  ;;  %v2552_v1 = vpop.f32.mrf.mxu1  ;;  %v3485_v11 = vld [vmem:[%s6056_s0 + $0x10c] sm:$0xf] }
 0x243   :  { %v2478_v2 = vpop.f32.mrf.mxu0 }
 0x244   :  { %v2479_v48 = vadd.f32 %v2478_v2, %v5461_v32  ;;  %v2355_v40 = vpop.f32.mrf.mxu2  ;;  %v3476_v2 = vld [vmem:[%s6056_s0 + $0xc4] sm:$0xf] }
 0x245   :  { %v5553_v53 = vadd.f32 %v2355_v40, %v4971_v62  ;;  %3439 = vmatmul.msk.bf16.vlgmr.msra.gmra.mxu1 %vm2108_vm0, %v2958_v41  ;;  %v3070_v62 = vor.u32 %v3485_v11, %v3067_v44 }
 0x246   :  { %v5556_v4 = vadd.f32 %v2552_v1, %v2479_v48  ;;  %2748 = vmatmul.bf16.vlgmr.msra.gmra.mxu0 %v2954_v13  ;;  %v3226_v13 = vor.u32 %v3530_v47, %v3225_v50  ;;  %v3035_v48 = vld [vmem:[%s6056_s0 + $0xe8] sm:$0xf0] }
 0x247   :  { %v3038_v11 = vor.u32 %v3476_v2, %v3035_v48  ;;  %v3550_v48 = vld [vmem:[%s6056_s0 + $0x30c] sm:$0xf0] }
 0x249   :  { %v2416_v63 = vpop.f32.mrf.mxu3 }
 0x24a   :  { %v5565_v32 = vadd.f32 %v2416_v63, %v5444_v45  ;;  %v2554_v16 = vpop.f32.mrf.mxu1 }
 0x24b   :  { %v2480_v43 = vpop.f32.mrf.mxu0 }
 0x24c   :  { %v2481_v22 = vadd.f32 %v2480_v43, %v5478_v60  ;;  %v2357_v51 = vpop.f32.mrf.mxu2  ;;  %v2993_v60 = vld [vmem:[%s6056_s0 + $0x70] sm:$0xf] }
 0x24d   :  { %v5575_v30 = vadd.f32 %v2357_v51, %v4999_v3  ;;  %v3471_v3 = vld [vmem:[%s6056_s0 + $0x94] sm:$0xf0]  ;;  %v3505_v51 = vld [vmem:[%s6056_s0 + $0x1ac] sm:$0xf] }
 0x24e   :  { %v5577_v45 = vadd.f32 %v2554_v16, %v2481_v22  ;;  %2689 = vmatmul.bf16.gmra.mxu3 %v3070_v62  ;;  %v2994_v28 = vor.u32 %v3471_v3, %v2993_v60  ;;  %v3540_v60 = vld [vmem:[%s6056_s0 + $0x2bc] sm:$0xf0] }
 0x251   :  { %v2419_v42 = vpop.f32.mrf.mxu3  ;;  %2630 = vmatmul.bf16.gmra.mxu2 %v3186_v39 }
 0x252   :  { %v5592_v5 = vadd.f32 %v2419_v42, %v5465_v33  ;;  %v2557_v18 = vpop.f32.mrf.mxu1  ;;  %v3107_v33 = vld [vmem:[%s6056_s0 + $0x180] sm:$0xf0] }
 0x253   :  { %v2483_v0 = vpop.f32.mrf.mxu0 }
 0x254   :  { %v2484_v15 = vadd.f32 %v2483_v0, %v5505_v58  ;;  %v2360_v46 = vpop.f32.mrf.mxu2  ;;  %v3486_v0 = vld [vmem:[%s6056_s0 + $0x114] sm:$0xf] }
 0x255   :  { %v5596_v31 = vadd.f32 %v2360_v46, %v5034_v34  ;;  %3440 = vmatmul.msk.bf16.gmra.mxu1 %vm2108_vm0, %v2998_v29  ;;  %v3110_v34 = vor.u32 %v3495_v59, %v3107_v33 }
 0x256   :  { %v5599_v38 = vadd.f32 %v2557_v18, %v2484_v15  ;;  %2753 = vmatmul.bf16.gmra.mxu0 %v2994_v28  ;;  %v3266_v28 = vor.u32 %v3540_v60, %v3265_v55  ;;  %v3075_v15 = vld [vmem:[%s6056_s0 + $0x138] sm:$0xf0]  ;;  %v3525_v55 = vld [vmem:[%s6056_s0 + $0x24c] sm:$0xf]  ;;  %v3227_v60 = vld [vmem:[%s6056_s0 + $0x270] sm:$0xf0] }
 0x257   :  { %v3078_v59 = vor.u32 %v3486_v0, %v3075_v15 }
 0x259   :  { %v2421_v6 = vpop.f32.mrf.mxu3 }
 0x25a   :  { %v5608_v58 = vadd.f32 %v2421_v6, %v5488_v49  ;;  %v2559_v14 = vpop.f32.mrf.mxu1 }
 0x25b   :  { %v2485_v57 = vpop.f32.mrf.mxu0 }
 0x25c   :  { %v2486_v8 = vadd.f32 %v2485_v57, %v5522_v61  ;;  %v2362_v41 = vpop.f32.mrf.mxu2  ;;  %v3033_v61 = vld [vmem:[%s6056_s0 + $0xc0] sm:$0xf]  ;;  %v3515_v57 = vld [vmem:[%s6056_s0 + $0x1fc] sm:$0xf] }
 0x25d   :  { %v5618_v1 = vadd.f32 %v2362_v41, %v5064_v54  ;;  %v3481_v54 = vld [vmem:[%s6056_s0 + $0xe4] sm:$0xf0] }
 0x25e   :  { %v5620_v49 = vadd.f32 %v2559_v14, %v2486_v8  ;;  %2694 = vmatmul.bf16.gmra.mxu3 %v3110_v34  ;;  %v3034_v16 = vor.u32 %v3481_v54, %v3033_v61  ;;  %v3187_v8 = vld [vmem:[%s6056_s0 + $0x220] sm:$0xf0] }
 0x25f   :  { %v3190_v2 = vor.u32 %v3515_v57, %v3187_v8 }
 0x261   :  { %v2424_v40 = vpop.f32.mrf.mxu3  ;;  %2635 = vmatmul.bf16.gmra.mxu2 %v3226_v13 }
 0x262   :  { %v5635_v44 = vadd.f32 %v2424_v40, %v5509_v27  ;;  %v2562_v63 = vpop.f32.mrf.mxu1  ;;  %v3147_v27 = vld [vmem:[%s6056_s0 + $0x1d0] sm:$0xf0] }
 0x263   :  { %v2488_v62 = vpop.f32.mrf.mxu0 }
 0x264   :  { %v2489_v21 = vadd.f32 %v2488_v62, %v5549_v19  ;;  %v2365_v12 = vpop.f32.mrf.mxu2 }
 0x265   :  { %v5639_v43 = vadd.f32 %v2365_v12, %v5099_v25  ;;  %3441 = vmatmul.msk.bf16.gmra.mxu1 %vm2108_vm0, %v3038_v11  ;;  %v3150_v25 = vor.u32 %v3505_v51, %v3147_v27 }
 0x266   :  { %v5642_v22 = vadd.f32 %v2562_v63, %v2489_v21  ;;  %2758 = vmatmul.bf16.gmra.mxu0 %v3034_v16  ;;  %v3115_v63 = vld [vmem:[%s6056_s0 + $0x188] sm:$0xf0]  ;;  %v3113_v16 = vld [vmem:[%s6056_s0 + $0x160] sm:$0xf] }
 0x269   :  { %v2426_v39 = vpop.f32.mrf.mxu3 }
 0x26a   :  { %v5651_v19 = vadd.f32 %v2426_v39, %v5532_v35  ;;  %v2564_v37 = vpop.f32.mrf.mxu1 }
 0x26b   :  { %v2490_v3 = vpop.f32.mrf.mxu0 }
 0x26c   :  { %v2491_v42 = vadd.f32 %v2490_v3, %v5565_v32  ;;  %v2367_v29 = vpop.f32.mrf.mxu2  ;;  %v3073_v32 = vld [vmem:[%s6056_s0 + $0x110] sm:$0xf] }
 0x26d   :  { %v5661_v18 = vadd.f32 %v2367_v29, %v5129_v23  ;;  %v3491_v23 = vld [vmem:[%s6056_s0 + $0x134] sm:$0xf0]  ;;  %v3230_v29 = vor.u32 %v3525_v55, %v3227_v60 }
 0x26e   :  { %v5663_v35 = vadd.f32 %v2564_v37, %v2491_v42  ;;  %2699 = vmatmul.bf16.gmra.mxu3 %v3150_v25  ;;  %v3074_v14 = vor.u32 %v3491_v23, %v3073_v32 }
 0x271   :  { %v2429_v46 = vpop.f32.mrf.mxu3  ;;  %2640 = vmatmul.bf16.gmra.mxu2 %v3266_v28  ;;  %v3560_v28 = vld [vmem:[%s6056_s0 + $0x35c] sm:$0xf0] }
 0x272   :  { %v2430_v33 = vadd.f32 %v2429_v46, %v5553_v53  ;;  %v2567_v6 = vpop.f32.mrf.mxu1 }
 0x273   :  { %v2493_v34 = vpop.f32.mrf.mxu0 }
 0x274   :  { %v2494_v50 = vadd.f32 %v2493_v34, %v5592_v5  ;;  %v3305_v5 = vld [vmem:[%s6056_s0 + $0x2e8] sm:$0xf]  ;;  %v5732_v0 = vpop.f32.mrf.mxu2 }
 0x275   :  { %3442 = vmatmul.msk.bf16.gmra.mxu1 %vm2108_vm0, %v3078_v59  ;;  %v3306_v40 = vor.u32 %v3550_v48, %v3305_v5  ;;  %v3155_v59 = vld [vmem:[%s6056_s0 + $0x1d8] sm:$0xf0] }
 0x276   :  { %v5680_v47 = vadd.f32 %v2567_v6, %v2494_v50  ;;  %2763 = vmatmul.bf16.gmra.mxu0 %v3074_v14  ;;  %v3153_v6 = vld [vmem:[%s6056_s0 + $0x1b0] sm:$0xf]  ;;  %v3535_v48 = vld [vmem:[%s6056_s0 + $0x29c] sm:$0xf] }
 0x279   :  { %v2431_v41 = vpop.f32.mrf.mxu3 }
 0x27a   :  { %v5689_v53 = vadd.f32 %v2431_v41, %v5575_v30  ;;  %v2569_v13 = vpop.f32.mrf.mxu1  ;;  %v3496_v30 = vld [vmem:[%s6056_s0 + $0x164] sm:$0xf] }
 0x27b   :  { %v2495_v61 = vpop.f32.mrf.mxu0  ;;  %v3118_v21 = vor.u32 %v3496_v30, %v3115_v63  ;;  %v3385_v30 = vld [vmem:[%s6056_s0 + $0x388] sm:$0xf]  ;;  %v3570_v63 = vld [vmem:[%s6056_s0 + $0x3ac] sm:$0xf0] }
 0x27c   :  { %v2496_v54 = vadd.f32 %v2495_v61, %v5608_v58  ;;  %v3501_v58 = vld [vmem:[%s6056_s0 + $0x184] sm:$0xf0]  ;;  %v3267_v61 = vld [vmem:[%s6056_s0 + $0x2c0] sm:$0xf0] }
 0x27d   :  { %v3114_v27 = vor.u32 %v3501_v58, %v3113_v16 }
 0x27e   :  { %v5698_v11 = vadd.f32 %v2569_v13, %v2496_v54  ;;  %2704 = vmatmul.bf16.gmra.mxu3 %v3190_v2  ;;  %v5750_v2 = vpop.f32.mrf.mxu2 }
 0x281   :  { %v2434_v62 = vpop.f32.mrf.mxu3  ;;  %2645 = vmatmul.bf16.gmra.mxu2 %v3306_v40 }
 0x282   :  { %v2435_v12 = vadd.f32 %v2434_v62, %v5596_v31  ;;  %v2572_v51 = vpop.f32.mrf.mxu1  ;;  %v3386_v62 = vor.u32 %v3570_v63, %v3385_v30 }
 0x283   :  { %v2498_v39 = vpop.f32.mrf.mxu0 }
 0x284   :  { %v2499_v37 = vadd.f32 %v2498_v39, %v5635_v44  ;;  %v3345_v44 = vld [vmem:[%s6056_s0 + $0x338] sm:$0xf]  ;;  %v3193_v39 = vld [vmem:[%s6056_s0 + $0x200] sm:$0xf] }
 0x285   :  { %3443 = vmatmul.msk.bf16.gmra.mxu1 %vm2108_vm0, %v3118_v21  ;;  %v3346_v23 = vor.u32 %v3560_v28, %v3345_v44  ;;  %v3545_v28 = vld [vmem:[%s6056_s0 + $0x2ec] sm:$0xf] }
 0x286   :  { %v5715_v25 = vadd.f32 %v2572_v51, %v2499_v37  ;;  %2768 = vmatmul.bf16.gmra.mxu0 %v3114_v27  ;;  %v3195_v51 = vld [vmem:[%s6056_s0 + $0x228] sm:$0xf0]  ;;  %v5777_v27 = vpop.f32.mrf.mxu2 }
 0x289   :  { %v2436_v3 = vpop.f32.mrf.mxu3 }
 0x28a   :  { %v5724_v31 = vadd.f32 %v2436_v3, %v5618_v1  ;;  %v2574_v42 = vpop.f32.mrf.mxu1  ;;  %v3506_v1 = vld [vmem:[%s6056_s0 + $0x1b4] sm:$0xf] }
 0x28b   :  { %v2500_v15 = vpop.f32.mrf.mxu0  ;;  %v3158_v34 = vor.u32 %v3506_v1, %v3155_v59 }
 0x28c   :  { %v2501_v32 = vadd.f32 %v2500_v15, %v5651_v19  ;;  %v3511_v19 = vld [vmem:[%s6056_s0 + $0x1d4] sm:$0xf0]  ;;  %v3307_v15 = vld [vmem:[%s6056_s0 + $0x310] sm:$0xf0] }
 0x28d   :  { %v3154_v8 = vor.u32 %v3511_v19, %v3153_v6  ;;  %v3310_v59 = vor.u32 %v3545_v28, %v3307_v15  ;;  %v3580_v6 = vld [vmem:[%s6056_s0 + $0x3fc] sm:$0xf0]  ;;  %v2602_v28 = vadd.f32 %v5732_v0, %v5308_v10  ;;  %v3387_v10 = vld [vmem:[%s6056_s0 + $0x3b0] sm:$0xf0]  ;;  %v2604_v0 = vadd.f32 %v5750_v2, %v5340_v36  ;;  %v3315_v36 = vld [vmem:[%s6056_s0 + $0x318] sm:$0xf0] }
 0x28e   :  { %v5735_v46 = vadd.f32 %v2574_v42, %v2501_v32  ;;  %2709 = vmatmul.bf16.gmra.mxu3 %v3230_v29  ;;  %v5794_v32 = vpop.f32.mrf.mxu2  ;;  %v3313_v2 = vld [vmem:[%s6056_s0 + $0x2f0] sm:$0xf] }
 0x291   :  { %v2439_v14 = vpop.f32.mrf.mxu3  ;;  %2650 = vmatmul.bf16.gmra.mxu2 %v3346_v23 }
 0x292   :  { %v2440_v50 = vadd.f32 %v2439_v14, %v5639_v43  ;;  %v2577_v57 = vpop.f32.mrf.mxu1 }
 0x293   :  { %v2503_v41 = vpop.f32.mrf.mxu0 }
 0x294   :  { %v2504_v13 = vadd.f32 %v2503_v41, %v2430_v33  ;;  %v3270_v33 = vor.u32 %v3535_v48, %v3267_v61  ;;  %v3235_v41 = vld [vmem:[%s6056_s0 + $0x278] sm:$0xf0] }
 0x295   :  { %3444 = vmatmul.msk.bf16.gmra.mxu1 %vm2108_vm0, %v3158_v34 }
 0x296   :  { %v5753_v5 = vadd.f32 %v2577_v57, %v2504_v13  ;;  %2773 = vmatmul.bf16.gmra.mxu0 %v3154_v8  ;;  %v3526_v8 = vld [vmem:[%s6056_s0 + $0x254] sm:$0xf]  ;;  %v3233_v13 = vld [vmem:[%s6056_s0 + $0x250] sm:$0xf] }
 0x297   :  { %v3238_v61 = vor.u32 %v3526_v8, %v3235_v41  ;;  %v3565_v41 = vld [vmem:[%s6056_s0 + $0x38c] sm:$0xf] }
 0x299   :  { %v2441_v43 = vpop.f32.mrf.mxu3 }
 0x29a   :  { %v2442_v54 = vadd.f32 %v2441_v43, %v5661_v18  ;;  %v2579_v40 = vpop.f32.mrf.mxu1  ;;  %v3516_v18 = vld [vmem:[%s6056_s0 + $0x204] sm:$0xf] }
 0x29b   :  { %v2505_v16 = vpop.f32.mrf.mxu0  ;;  %v3198_v55 = vor.u32 %v3516_v18, %v3195_v51 }
 0x29c   :  { %v2506_v58 = vadd.f32 %v2505_v16, %v5689_v53  ;;  %v3521_v53 = vld [vmem:[%s6056_s0 + $0x224] sm:$0xf0] }
 0x29d   :  { %v3194_v3 = vor.u32 %v3521_v53, %v3193_v39 }
 0x29e   :  { %v5769_v21 = vadd.f32 %v2579_v40, %v2506_v58  ;;  %2714 = vmatmul.bf16.gmra.mxu3 %v3270_v33  ;;  %v5817_v33 = vpop.f32.mrf.mxu2  ;;  %v3555_v58 = vld [vmem:[%s6056_s0 + $0x33c] sm:$0xf] }
 0x2a1   :  { %v2675_v37 = vpop.f32.mrf.mxu3  ;;  %2655 = vmatmul.bf16.gmra.mxu2 %v3386_v62  ;;  %v3347_v62 = vld [vmem:[%s6056_s0 + $0x360] sm:$0xf0] }
 0x2a2   :  { %v2582_v60 = vpop.f32.mrf.mxu1  ;;  %v3350_v39 = vor.u32 %v3555_v58, %v3347_v62  ;;  %v2607_v58 = vadd.f32 %v5777_v27, %v5370_v20  ;;  %v3575_v20 = vld [vmem:[%s6056_s0 + $0x3dc] sm:$0xf]  ;;  %v3427_v27 = vld [vmem:[%s6056_s0 + $0x400] sm:$0xf0] }
 0x2a3   :  { %v2508_v42 = vpop.f32.mrf.mxu0 }
 0x2a4   :  { %v2509_v29 = vadd.f32 %v2508_v42, %v2435_v12  ;;  %v3425_v12 = vld [vmem:[%s6056_s0 + $0x3d8] sm:$0xf]  ;;  %v3275_v42 = vld [vmem:[%s6056_s0 + $0x2c8] sm:$0xf0] }
 0x2a5   :  { %3445 = vmatmul.msk.bf16.gmra.mxu1 %vm2108_vm0, %v3198_v55  ;;  %v3426_v34 = vor.u32 %v3580_v6, %v3425_v12 }
 0x2a6   :  { %v5786_v44 = vadd.f32 %v2582_v60, %v2509_v29  ;;  %2778 = vmatmul.bf16.gmra.mxu0 %v3194_v3  ;;  %v5828_v60 = vpop.f32.mrf.mxu2  ;;  %v3536_v3 = vld [vmem:[%s6056_s0 + $0x2a4] sm:$0xf]  ;;  %v3273_v29 = vld [vmem:[%s6056_s0 + $0x2a0] sm:$0xf] }
 0x2a9   :  { %v2677_v23 = vpop.f32.mrf.mxu3 }
 0x2aa   :  { %v2584_v1 = vpop.f32.mrf.mxu1 }
 0x2ab   :  { %v2510_v19 = vpop.f32.mrf.mxu0 }
 0x2ac   :  { %v2511_v14 = vadd.f32 %v2510_v19, %v5724_v31  ;;  %v3531_v31 = vld [vmem:[%s6056_s0 + $0x274] sm:$0xf0] }
 0x2ad   :  { %v3234_v40 = vor.u32 %v3531_v31, %v3233_v13  ;;  %v2678_v13 = vadd.f32 %v2677_v23, %v2604_v0  ;;  %v3551_v23 = vld [vmem:[%s6056_s0 + $0x314] sm:$0xf0] }
 0x2ae   :  { %v5803_v57 = vadd.f32 %v2584_v1, %v2511_v14  ;;  %2719 = vmatmul.bf16.gmra.mxu3 %v3310_v59  ;;  %v3278_v1 = vor.u32 %v3536_v3, %v3275_v42  ;;  %v2676_v59 = vadd.f32 %v2675_v37, %v2602_v28  ;;  %v5849_v8 = vpop.f32.mrf.mxu2  ;;  %v3314_v3 = vor.u32 %v3551_v23, %v3313_v2 }
 0x2af   :  { %v2609_v28 = vadd.f32 %v5794_v32, %v5402_v7  ;;  %v3355_v7 = vld [vmem:[%s6056_s0 + $0x368] sm:$0xf0]  ;;  %v3353_v32 = vld [vmem:[%s6056_s0 + $0x340] sm:$0xf] }
 0x2b1   :  { %v2680_v48 = vpop.f32.mrf.mxu3  ;;  %2660 = vmatmul.bf16.gmra.mxu2 %v3426_v34 }
 0x2b2   :  { %v2587_v43 = vpop.f32.mrf.mxu1 }
 0x2b3   :  { %v2513_v30 = vpop.f32.mrf.mxu0 }
 0x2b4   :  { %v2514_v63 = vadd.f32 %v2513_v30, %v2440_v50 }
 0x2b5   :  { %3446 = vmatmul.msk.bf16.gmra.mxu1 %vm2108_vm0, %v3238_v61  ;;  %v3390_v61 = vor.u32 %v3565_v41, %v3387_v10  ;;  %v3556_v41 = vld [vmem:[%s6056_s0 + $0x344] sm:$0xf]  ;;  %v2612_v10 = vadd.f32 %v5817_v33, %v5425_v24  ;;  %v2614_v24 = vadd.f32 %v5828_v60, %v5446_v26  ;;  %v3393_v60 = vld [vmem:[%s6056_s0 + $0x390] sm:$0xf] }
 0x2b6   :  { %v5820_v16 = vadd.f32 %v2587_v43, %v2514_v63  ;;  %2783 = vmatmul.bf16.gmra.mxu0 %v3234_v40  ;;  %v3546_v63 = vld [vmem:[%s6056_s0 + $0x2f4] sm:$0xf]  ;;  %v5881_v62 = vpop.f32.mrf.mxu2 }
 0x2b9   :  { %v2682_v18 = vpop.f32.mrf.mxu3 }
 0x2ba   :  { %v2589_v51 = vpop.f32.mrf.mxu1 }
 0x2bb   :  { %v2515_v53 = vpop.f32.mrf.mxu0 }
 0x2bc   :  { %v2516_v55 = vadd.f32 %v2515_v53, %v2442_v54  ;;  %v3541_v54 = vld [vmem:[%s6056_s0 + $0x2c4] sm:$0xf0]  ;;  %v2681_v53 = vadd.f32 %v2680_v48, %v2607_v58 }
 0x2bd   :  { %v3274_v6 = vor.u32 %v3541_v54, %v3273_v29 }
 0x2be   :  { %v5830_v50 = vadd.f32 %v2589_v51, %v2516_v55  ;;  %2724 = vmatmul.bf16.gmra.mxu3 %v3350_v39  ;;  %v3318_v39 = vor.u32 %v3546_v63, %v3315_v36 }
 0x2c1   :  { %v5846_v15 = vpop.f32.mrf.mxu3 }
 0x2c2   :  { %v2823_v12 = vpop.f32.mrf.mxu1 }
 0x2c3   :  { %v2749_v19 = vpop.f32.mrf.mxu0 }
 0x2c4   :  { %v2750_v14 = vadd.f32 %v2749_v19, %v2676_v59 }
 0x2c5   :  { %3447 = vmatmul.msk.bf16.gmra.mxu1 %vm2108_vm0, %v3278_v1  ;;  %v2683_v1 = vadd.f32 %v2682_v18, %v2609_v28  ;;  %v3561_v18 = vld [vmem:[%s6056_s0 + $0x364] sm:$0xf0] }
 0x2c6   :  { %v2824_v34 = vadd.f32 %v2823_v12, %v2750_v14  ;;  %2788 = vmatmul.bf16.gmra.mxu0 %v3274_v6  ;;  %v3430_v12 = vor.u32 %v3575_v20, %v3427_v27  ;;  %v2621_v6 = vpop.f32.mrf.mxu2 }
 0x2c8   :  { %2889 = vst.msk [vmem:[%s6057_s3] sm:$0xff] %vm2888_vm1, %v2824_v34 }
 0x2c9   :  { %v2687_v37 = vpop.f32.mrf.mxu3 }
 0x2ca   :  { %v2825_v31 = vpop.f32.mrf.mxu1  ;;  %v2688_v2 = vadd.f32 %v2687_v37, %v2614_v24  ;;  %v3571_v37 = vld [vmem:[%s6056_s0 + $0x3b4] sm:$0xf0] }
 0x2cb   :  { %v2751_v43 = vpop.f32.mrf.mxu0  ;;  %v3394_v27 = vor.u32 %v3571_v37, %v3393_v60 }
 0x2cc   :  { %v2752_v40 = vadd.f32 %v2751_v43, %v2678_v13  ;;  %v3358_v13 = vor.u32 %v3556_v41, %v3355_v7  ;;  %v3354_v43 = vor.u32 %v3561_v18, %v3353_v32  ;;  %v3576_v7 = vld [vmem:[%s6056_s0 + $0x3e4] sm:$0xf]  ;;  %v2622_v32 = vadd.f32 %v2621_v6, %v5513_v56 }
 0x2ce   :  { %v2826_v30 = vadd.f32 %v2825_v31, %v2752_v40  ;;  %2729 = vmatmul.bf16.gmra.mxu3 %v3390_v61  ;;  %v2686_v31 = vadd.f32 %v5846_v15, %v2612_v10  ;;  %v2623_v63 = vpop.f32.mrf.mxu2 }
 0x2cf   :  { %v2624_v24 = vadd.f32 %v2623_v63, %v5534_v17 }
 0x2d0   :  { %2890 = vst.msk [vmem:[%s6057_s3 + $0x8] sm:$0xff] %vm2888_vm1, %v2826_v30 }
 0x2d1   :  { %v2690_v51 = vpop.f32.mrf.mxu3 }
 0x2d2   :  { %v2828_v55 = vpop.f32.mrf.mxu1 }
 0x2d3   :  { %v2754_v42 = vpop.f32.mrf.mxu0 }
 0x2d4   :  { %v2755_v29 = vadd.f32 %v2754_v42, %v2681_v53  ;;  %v3566_v53 = vld [vmem:[%s6056_s0 + $0x394] sm:$0xf] }
 0x2d5   :  { %3448 = vmatmul.msk.bf16.gmra.mxu1 %vm2108_vm0, %v3318_v39 }
 0x2d6   :  { %v2829_v54 = vadd.f32 %v2828_v55, %v2755_v29  ;;  %2793 = vmatmul.bf16.gmra.mxu0 %v3314_v3  ;;  %v3395_v55 = vld [vmem:[%s6056_s0 + $0x3b8] sm:$0xf0]  ;;  %v2626_v26 = vpop.f32.mrf.mxu2  ;;  %v2617_v3 = vadd.f32 %v5849_v8, %v5469_v9 }
 0x2d7   :  { %v3398_v29 = vor.u32 %v3566_v53, %v3395_v55 }
 0x2d8   :  { %2891 = vst.msk [vmem:[%s6057_s3 + $0x10] sm:$0xff] %vm2888_vm1, %v2829_v54  ;;  %v2691_v54 = vadd.f32 %v2690_v51, %v2617_v3 }
 0x2d9   :  { %v2692_v48 = vpop.f32.mrf.mxu3 }
 0x2da   :  { %v2830_v59 = vpop.f32.mrf.mxu1 }
 0x2db   :  { %v2756_v19 = vpop.f32.mrf.mxu0 }
 0x2dc   :  { %v2757_v14 = vadd.f32 %v2756_v19, %v2683_v1 }
 0x2de   :  { %v2831_v34 = vadd.f32 %v2830_v59, %v2757_v14  ;;  %2734 = vmatmul.bf16.gmra.mxu3 %v3430_v12  ;;  %v2619_v12 = vadd.f32 %v5881_v62, %v5490_v52  ;;  %v2628_v9 = vpop.f32.mrf.mxu2  ;;  %v3435_v52 = vld [vmem:[%s6056_s0 + $0x408] sm:$0xf0]  ;;  %v3433_v62 = vld [vmem:[%s6056_s0 + $0x3e0] sm:$0xf] }
 0x2df   :  { %v3438_v18 = vor.u32 %v3576_v7, %v3435_v52 }
 0x2e0   :  { %2892 = vst.msk [vmem:[%s6057_s3 + $0x18] sm:$0xff] %vm2888_vm1, %v2831_v34  ;;  %v2693_v8 = vadd.f32 %v2692_v48, %v2619_v12  ;;  %v3581_v48 = vld [vmem:[%s6056_s0 + $0x404] sm:$0xf0] }
 0x2e1   :  { %v2695_v0 = vpop.f32.mrf.mxu3 }
 0x2e2   :  { %v2833_v61 = vpop.f32.mrf.mxu1  ;;  %v2696_v10 = vadd.f32 %v2695_v0, %v2622_v32 }
 0x2e3   :  { %v2759_v40 = vpop.f32.mrf.mxu0 }
 0x2e4   :  { %v2760_v30 = vadd.f32 %v2759_v40, %v2686_v31  ;;  %v3434_v31 = vor.u32 %v3581_v48, %v3433_v62 }
 0x2e5   :  { %3449 = vmatmul.msk.bf16.gmra.mxu1 %vm2108_vm0, %v3358_v13 }
 0x2e6   :  { %v2834_v36 = vadd.f32 %v2833_v61, %v2760_v30  ;;  %2798 = vmatmul.bf16.gmra.mxu0 %v3354_v43  ;;  %v2631_v61 = vpop.f32.mrf.mxu2 }
 0x2e8   :  { %2893 = vst.msk [vmem:[%s6057_s3 + $0x20] sm:$0xff] %vm2888_vm1, %v2834_v36 }
 0x2e9   :  { %v2697_v33 = vpop.f32.mrf.mxu3 }
 0x2ea   :  { %v2835_v15 = vpop.f32.mrf.mxu1  ;;  %v2698_v56 = vadd.f32 %v2697_v33, %v2624_v24  ;;  %v2629_v33 = vadd.f32 %v2628_v9, %v5577_v45 }
 0x2eb   :  { %v2761_v23 = vpop.f32.mrf.mxu0 }
 0x2ec   :  { %v2762_v58 = vadd.f32 %v2761_v23, %v2688_v2 }
 0x2ee   :  { %v2836_v39 = vadd.f32 %v2835_v15, %v2762_v58  ;;  %v2633_v15 = vpop.f32.mrf.mxu2 }
 0x2f0   :  { %2894 = vst.msk [vmem:[%s6057_s3 + $0x28] sm:$0xff] %vm2888_vm1, %v2836_v39  ;;  %v2627_v39 = vadd.f32 %v2626_v26, %v5556_v4 }
 0x2f1   :  { %v2700_v42 = vpop.f32.mrf.mxu3 }
 0x2f2   :  { %v2838_v20 = vpop.f32.mrf.mxu1  ;;  %v2701_v17 = vadd.f32 %v2700_v42, %v2627_v39  ;;  %v2632_v42 = vadd.f32 %v2631_v61, %v5599_v38 }
 0x2f3   :  { %v2764_v28 = vpop.f32.mrf.mxu0 }
 0x2f4   :  { %v2765_v1 = vadd.f32 %v2764_v28, %v2691_v54 }
 0x2f5   :  { %3450 = vmatmul.msk.bf16.gmra.mxu1 %vm2108_vm0, %v3398_v29 }
 0x2f6   :  { %v2839_v59 = vadd.f32 %v2838_v20, %v2765_v1  ;;  %2803 = vmatmul.bf16.gmra.mxu0 %v3394_v27  ;;  %v2636_v37 = vpop.f32.mrf.mxu2 }
 0x2f7   :  { %v2637_v52 = vadd.f32 %v2636_v37, %v5642_v22 }
 0x2f8   :  { %2895 = vst.msk [vmem:[%s6057_s3 + $0x30] sm:$0xff] %vm2888_vm1, %v2839_v59 }
 0x2f9   :  { %v2702_v51 = vpop.f32.mrf.mxu3 }
 0x2fa   :  { %v2840_v19 = vpop.f32.mrf.mxu1  ;;  %v2703_v4 = vadd.f32 %v2702_v51, %v2629_v33 }
 0x2fb   :  { %v2766_v14 = vpop.f32.mrf.mxu0 }
 0x2fc   :  { %v2767_v34 = vadd.f32 %v2766_v14, %v2693_v8  ;;  %v2634_v8 = vadd.f32 %v2633_v15, %v5620_v49 }
 0x2fe   :  { %v2841_v41 = vadd.f32 %v2840_v19, %v2767_v34  ;;  %v2638_v27 = vpop.f32.mrf.mxu2 }
 0x300   :  { %2896 = vst.msk [vmem:[%s6057_s3 + $0x38] sm:$0xff] %vm2888_vm1, %v2841_v41 }
 0x301   :  { %v2705_v30 = vpop.f32.mrf.mxu3 }
 0x302   :  { %v2843_v13 = vpop.f32.mrf.mxu1  ;;  %v2706_v45 = vadd.f32 %v2705_v30, %v2632_v42 }
 0x303   :  { %v2769_v43 = vpop.f32.mrf.mxu0 }
 0x304   :  { %v2770_v40 = vadd.f32 %v2769_v43, %v2696_v10 }
 0x305   :  { %3451 = vmatmul.msk.bf16.gmra.mxu1 %vm2108_vm0, %v3438_v18 }
 0x306   :  { %v2844_v36 = vadd.f32 %v2843_v13, %v2770_v40  ;;  %2808 = vmatmul.bf16.gmra.mxu0 %v3434_v31  ;;  %v2641_v51 = vpop.f32.mrf.mxu2  ;;  %v2639_v31 = vadd.f32 %v2638_v27, %v5663_v35 }
 0x307   :  { %v2642_v24 = vadd.f32 %v2641_v51, %v5680_v47 }
 0x308   :  { %2897 = vst.msk [vmem:[%s6057_s3 + $0x40] sm:$0xff] %vm2888_vm1, %v2844_v36 }
 0x309   :  { %v2707_v58 = vpop.f32.mrf.mxu3 }
 0x30a   :  { %v2845_v6 = vpop.f32.mrf.mxu1  ;;  %v2708_v38 = vadd.f32 %v2707_v58, %v2634_v8 }
 0x30b   :  { %v2771_v0 = vpop.f32.mrf.mxu0 }
 0x30c   :  { %v2772_v2 = vadd.f32 %v2771_v0, %v2698_v56 }
 0x30e   :  { %v2846_v23 = vadd.f32 %v2845_v6, %v2772_v2  ;;  %v2643_v18 = vpop.f32.mrf.mxu2 }
 0x310   :  { %2898 = vst.msk [vmem:[%s6057_s3 + $0x48] sm:$0xff] %vm2888_vm1, %v2846_v23  ;;  %v2644_v23 = vadd.f32 %v2643_v18, %v5698_v11 }
 0x311   :  { %v2710_v3 = vpop.f32.mrf.mxu3 }
 0x312   :  { %v2848_v63 = vpop.f32.mrf.mxu1  ;;  %v2711_v49 = vadd.f32 %v2710_v3, %v2637_v52 }
 0x313   :  { %v2774_v53 = vpop.f32.mrf.mxu0 }
 0x314   :  { %v2775_v55 = vadd.f32 %v2774_v53, %v2701_v17 }
 0x316   :  { %v2849_v60 = vadd.f32 %v2848_v63, %v2775_v55  ;;  %v2646_v36 = vpop.f32.mrf.mxu2 }
 0x318   :  { %2899 = vst.msk [vmem:[%s6057_s3 + $0x50] sm:$0xff] %vm2888_vm1, %v2849_v60  ;;  %v2647_v60 = vadd.f32 %v2646_v36, %v5715_v25 }
 0x319   :  { %v2712_v1 = vpop.f32.mrf.mxu3 }
 0x31a   :  { %v2850_v26 = vpop.f32.mrf.mxu1  ;;  %v2713_v22 = vadd.f32 %v2712_v1, %v2639_v31 }
 0x31b   :  { %v2776_v29 = vpop.f32.mrf.mxu0 }
 0x31c   :  { %v2777_v54 = vadd.f32 %v2776_v29, %v2703_v4 }
 0x31e   :  { %v2851_v20 = vadd.f32 %v2850_v26, %v2777_v54  ;;  %v2648_v58 = vpop.f32.mrf.mxu2 }
 0x31f   :  { %v2649_v54 = vadd.f32 %v2648_v58, %v5735_v46 }
 0x320   :  { %2900 = vst.msk [vmem:[%s6057_s3 + $0x58] sm:$0xff] %vm2888_vm1, %v2851_v20 }
 0x321   :  { %v2715_v41 = vpop.f32.mrf.mxu3 }
 0x322   :  { %v2853_v28 = vpop.f32.mrf.mxu1  ;;  %v2716_v35 = vadd.f32 %v2715_v41, %v2642_v24 }
 0x323   :  { %v2779_v59 = vpop.f32.mrf.mxu0 }
 0x324   :  { %v2780_v12 = vadd.f32 %v2779_v59, %v2706_v45 }
 0x326   :  { %v2854_v9 = vadd.f32 %v2853_v28, %v2780_v12  ;;  %v2651_v33 = vpop.f32.mrf.mxu2 }
 0x327   :  { %v2652_v59 = vadd.f32 %v2651_v33, %v5753_v5 }
 0x328   :  { %2901 = vst.msk [vmem:[%s6057_s3 + $0x60] sm:$0xff] %vm2888_vm1, %v2854_v9 }
 0x329   :  { %v2717_v13 = vpop.f32.mrf.mxu3 }
 0x32a   :  { %v2855_v19 = vpop.f32.mrf.mxu1  ;;  %v2718_v47 = vadd.f32 %v2717_v13, %v2644_v23 }
 0x32b   :  { %v2781_v14 = vpop.f32.mrf.mxu0 }
 0x32c   :  { %v2782_v34 = vadd.f32 %v2781_v14, %v2708_v38 }
 0x32e   :  { %v2856_v7 = vadd.f32 %v2855_v19, %v2782_v34  ;;  %v2653_v45 = vpop.f32.mrf.mxu2 }
 0x32f   :  { %v2654_v51 = vadd.f32 %v2653_v45, %v5769_v21 }
 0x330   :  { %2902 = vst.msk [vmem:[%s6057_s3 + $0x68] sm:$0xff] %vm2888_vm1, %v2856_v7 }
 0x331   :  { %v2720_v56 = vpop.f32.mrf.mxu3 }
 0x332   :  { %v2858_v62 = vpop.f32.mrf.mxu1  ;;  %v2721_v11 = vadd.f32 %v2720_v56, %v2647_v60 }
 0x333   :  { %v2784_v48 = vpop.f32.mrf.mxu0 }
 0x334   :  { %v2785_v32 = vadd.f32 %v2784_v48, %v2711_v49 }
 0x336   :  { %v2859_v10 = vadd.f32 %v2858_v62, %v2785_v32  ;;  %v2656_v19 = vpop.f32.mrf.mxu2 }
 0x337   :  { %v2657_v49 = vadd.f32 %v2656_v19, %v5786_v44 }
 0x338   :  { %2903 = vst.msk [vmem:[%s6057_s3 + $0x70] sm:$0xff] %vm2888_vm1, %v2859_v10 }
 0x339   :  { %v2722_v17 = vpop.f32.mrf.mxu3 }
 0x33a   :  { %v2860_v61 = vpop.f32.mrf.mxu1  ;;  %v2723_v25 = vadd.f32 %v2722_v17, %v2649_v54 }
 0x33b   :  { %v2786_v43 = vpop.f32.mrf.mxu0 }
 0x33c   :  { %v2787_v40 = vadd.f32 %v2786_v43, %v2713_v22 }
 0x33e   :  { %v2861_v30 = vadd.f32 %v2860_v61, %v2787_v40  ;;  %v2658_v62 = vpop.f32.mrf.mxu2 }
 0x33f   :  { %v2659_v31 = vadd.f32 %v2658_v62, %v5803_v57 }
 0x340   :  { %2904 = vst.msk [vmem:[%s6057_s3 + $0x78] sm:$0xff] %vm2888_vm1, %v2861_v30 }
 0x341   :  { %v2725_v26 = vpop.f32.mrf.mxu3 }
 0x342   :  { %v2863_v6 = vpop.f32.mrf.mxu1  ;;  %v2726_v46 = vadd.f32 %v2725_v26, %v2652_v59 }
 0x343   :  { %v2789_v0 = vpop.f32.mrf.mxu0 }
 0x344   :  { %v2790_v2 = vadd.f32 %v2789_v0, %v2716_v35 }
 0x346   :  { %v2864_v15 = vadd.f32 %v2863_v6, %v2790_v2  ;;  %v2661_v61 = vpop.f32.mrf.mxu2 }
 0x347   :  { %v2662_v24 = vadd.f32 %v2661_v61, %v5820_v16 }
 0x348   :  { %2905 = vst.msk [vmem:[%s6057_s3 + $0x80] sm:$0xff] %vm2888_vm1, %v2864_v15 }
 0x349   :  { %v2727_v1 = vpop.f32.mrf.mxu3 }
 0x34a   :  { %v2865_v39 = vpop.f32.mrf.mxu1  ;;  %v2728_v5 = vadd.f32 %v2727_v1, %v2654_v51 }
 0x34b   :  { %v2791_v63 = vpop.f32.mrf.mxu0 }
 0x34c   :  { %v2792_v53 = vadd.f32 %v2791_v63, %v2718_v47 }
 0x34e   :  { %v2866_v55 = vadd.f32 %v2865_v39, %v2792_v53  ;;  %v2663_v0 = vpop.f32.mrf.mxu2 }
 0x34f   :  { %v2664_v23 = vadd.f32 %v2663_v0, %v5830_v50 }
 0x350   :  { %2906 = vst.msk [vmem:[%s6057_s3 + $0x88] sm:$0xff] %vm2888_vm1, %v2866_v55 }
 0x351   :  { %v2730_v14 = vpop.f32.mrf.mxu3 }
 0x352   :  { %v2868_v37 = vpop.f32.mrf.mxu1  ;;  %v2731_v21 = vadd.f32 %v2730_v14, %v2657_v49 }
 0x353   :  { %v2794_v3 = vpop.f32.mrf.mxu0 }
 0x354   :  { %v2795_v4 = vadd.f32 %v2794_v3, %v2721_v11 }
 0x356   :  { %v2869_v29 = vadd.f32 %v2868_v37, %v2795_v4 }
 0x358   :  { %2907 = vst.msk [vmem:[%s6057_s3 + $0x90] sm:$0xff] %vm2888_vm1, %v2869_v29 }
 0x359   :  { %v2732_v32 = vpop.f32.mrf.mxu3 }
 0x35a   :  { %v2870_v20 = vpop.f32.mrf.mxu1  ;;  %v2733_v44 = vadd.f32 %v2732_v32, %v2659_v31 }
 0x35b   :  { %v2796_v42 = vpop.f32.mrf.mxu0 }
 0x35c   :  { %v2797_v27 = vadd.f32 %v2796_v42, %v2723_v25 }
 0x35e   :  { %v2871_v28 = vadd.f32 %v2870_v20, %v2797_v27 }
 0x360   :  { %2908 = vst.msk [vmem:[%s6057_s3 + $0x98] sm:$0xff] %vm2888_vm1, %v2871_v28 }
 0x361   :  { %v2735_v30 = vpop.f32.mrf.mxu3 }
 0x362   :  { %v2873_v12 = vpop.f32.mrf.mxu1  ;;  %v2736_v57 = vadd.f32 %v2735_v30, %v2662_v24 }
 0x363   :  { %v2799_v9 = vpop.f32.mrf.mxu0 }
 0x364   :  { %v2800_v8 = vadd.f32 %v2799_v9, %v2726_v46 }
 0x366   :  { %v2874_v38 = vadd.f32 %v2873_v12, %v2800_v8 }
 0x368   :  { %2909 = vst.msk [vmem:[%s6057_s3 + $0xa0] sm:$0xff] %vm2888_vm1, %v2874_v38 }
 0x369   :  { %v2737_v15 = vpop.f32.mrf.mxu3 }
 0x36a   :  { %v2875_v34 = vpop.f32.mrf.mxu1  ;;  %v2738_v16 = vadd.f32 %v2737_v15, %v2664_v23 }
 0x36b   :  { %v2801_v41 = vpop.f32.mrf.mxu0 }
 0x36c   :  { %v2802_v7 = vadd.f32 %v2801_v41, %v2728_v5 }
 0x36e   :  { %v2876_v52 = vadd.f32 %v2875_v34, %v2802_v7 }
 0x370   :  { %2910 = vst.msk [vmem:[%s6057_s3 + $0xa8] sm:$0xff] %vm2888_vm1, %v2876_v52 }
 0x372   :  { %v2878_v48 = vpop.f32.mrf.mxu1 }
 0x373   :  { %v2804_v18 = vpop.f32.mrf.mxu0 }
 0x374   :  { %v2805_v10 = vadd.f32 %v2804_v18, %v2731_v21 }
 0x376   :  { %v2879_v13 = vadd.f32 %v2878_v48, %v2805_v10 }
 0x378   :  { %2911 = vst.msk [vmem:[%s6057_s3 + $0xb0] sm:$0xff] %vm2888_vm1, %v2879_v13 }
 0x37a   :  { %v2880_v22 = vpop.f32.mrf.mxu1 }
 0x37b   :  { %v2806_v43 = vpop.f32.mrf.mxu0 }
 0x37c   :  { %v2807_v40 = vadd.f32 %v2806_v43, %v2733_v44 }
 0x37e   :  { %v2881_v36 = vadd.f32 %v2880_v22, %v2807_v40 }
 0x380   :  { %2912 = vst.msk [vmem:[%s6057_s3 + $0xb8] sm:$0xff] %vm2888_vm1, %v2881_v36 }
 0x382   :  { %v2883_v35 = vpop.f32.mrf.mxu1 }
 0x383   :  { %v2809_v56 = vpop.f32.mrf.mxu0 }
 0x384   :  { %v2810_v6 = vadd.f32 %v2809_v56, %v2736_v57 }
 0x386   :  { %v2884_v2 = vadd.f32 %v2883_v35, %v2810_v6 }
 0x388   :  { %2913 = vst.msk [vmem:[%s6057_s3 + $0xc0] sm:$0xff] %vm2888_vm1, %v2884_v2 }
 0x38a   :  { %v2885_v39 = vpop.f32.mrf.mxu1 }
 0x38b   :  { %v2811_v58 = vpop.f32.mrf.mxu0 }
 0x38c   :  { %v2812_v47 = vadd.f32 %v2811_v58, %v2738_v16 }
 0x38e   :  { %v2886_v17 = vadd.f32 %v2885_v39, %v2812_v47 }
 0x390   :  { %2914 = vst.msk [vmem:[%s6057_s3 + $0xc8] sm:$0xff] %vm2888_vm1, %v2886_v17 }

</bundles_post_ra>
